<compile_context>
chip_gen: v7x
topology: tpu7x:2x2x1
jax: 0.10.0
libtpu: 0.0.40
codegen_flags: <defaults>
</compile_context>

<pallas_src>
import functools

import jax
import jax.numpy as jnp
from jax.experimental import pallas as pl
from jax.experimental.pallas import tpu as pltpu

# ---------------- tiny BERT config (deterministic, synthetic) ----------------
VOCAB = 64
HIDDEN = 32
N_LAYERS = 2
N_HEADS = 2
HEAD_DIM = HIDDEN // N_HEADS
INTERMEDIATE = 64
MAX_POS = 16
TYPE_VOCAB = 2
LN_EPS = 1e-12
NEG_INF = -1e9


# ------------------------------ kernel helpers --------------------------------
def _layer_norm(x, g, b):
    mean = jnp.mean(x, axis=-1, keepdims=True)
    xc = x - mean
    var = jnp.mean(xc * xc, axis=-1, keepdims=True)
    return xc * jax.lax.rsqrt(var + LN_EPS) * g + b


def _gelu(x):
    # TODO(synk): HF BERT default is exact erf-GELU; tanh approximation used here.
    return 0.5 * x * (1.0 + jnp.tanh(
        0.7978845608028654 * (x + 0.044715 * x * x * x)))


# ------------------------------ fused Pallas kernel ---------------------------
def _fused_bert_kernel(ids_ref, mask_ref, semb_ref, wemb_ref, embln_ref,
                       wqkv_ref, bqkv_ref, wo_ref, hvec_ref, b1_ref,
                       w1_ref, w2_ref, wclf_ref, bclf_ref,
                       out_ref, *, batch, seq, n_layers, n_heads, head_dim):
    rows = batch * seq
    hidden = n_heads * head_dim
    scale = 1.0 / (head_dim ** 0.5)
    bf16 = jnp.bfloat16

    # ---- word embedding via one-hot matmul (data-dependent gather on MXU) ----
    ids = ids_ref[...]                                     # (rows, 1) int32
    iota = jax.lax.broadcasted_iota(jnp.int32, (rows, VOCAB), 1)
    onehot = jnp.where(iota == ids, 1.0, 0.0).astype(bf16)
    emb = jnp.dot(onehot, wemb_ref[...], preferred_element_type=jnp.float32)
    # position + token-type embeddings precomputed host-side (static / cheap).
    emb = emb + semb_ref[...]                              # (rows, hidden) f32

    h = _layer_norm(emb, embln_ref[0], embln_ref[1])       # (rows, hidden) f32
    mask = mask_ref[...]                                   # (rows, rows) additive

    # ---- encoder layers (statically unrolled, fully VMEM-resident) ----------
    for l in range(n_layers):
        h_bf = h.astype(bf16)
        attn = jnp.zeros((rows, hidden), jnp.float32)
        for hh in range(n_heads):
            iq = (l * 3 + 0) * n_heads + hh
            ik = (l * 3 + 1) * n_heads + hh
            iv = (l * 3 + 2) * n_heads + hh
            q = (jnp.dot(h_bf, wqkv_ref[iq], preferred_element_type=jnp.float32)
                 + bqkv_ref[iq])                           # (rows, head_dim)
            k = (jnp.dot(h_bf, wqkv_ref[ik], preferred_element_type=jnp.float32)
                 + bqkv_ref[ik])
            v = (jnp.dot(h_bf, wqkv_ref[iv], preferred_element_type=jnp.float32)
                 + bqkv_ref[iv])
            # one (rows, rows) score matmul per head; block-diagonal mask keeps
            # attention within each batch element and applies key padding.
            s = jax.lax.dot_general(q.astype(bf16), k.astype(bf16),
                                    (((1,), (1,)), ((), ())),
                                    preferred_element_type=jnp.float32)
            s = s * scale + mask
            s = s - jnp.max(s, axis=-1, keepdims=True)
            p = jnp.exp(s)
            p = p * pl.reciprocal(jnp.sum(p, axis=-1, keepdims=True), approx=True)
            ctx = jnp.dot(p.astype(bf16), v.astype(bf16),
                          preferred_element_type=jnp.float32)   # (rows, head_dim)
            # per-head output projection accumulated — no lane concat needed.
            attn = attn + jnp.dot(ctx.astype(bf16), wo_ref[l * n_heads + hh],
                                  preferred_element_type=jnp.float32)
        attn = attn + hvec_ref[l * 6 + 0]                  # output-proj bias
        h = _layer_norm(attn + h, hvec_ref[l * 6 + 1], hvec_ref[l * 6 + 2])

        h_bf = h.astype(bf16)
        ffn = (jnp.dot(h_bf, w1_ref[l], preferred_element_type=jnp.float32)
               + b1_ref[l])
        ffn = _gelu(ffn)
        ffn = (jnp.dot(ffn.astype(bf16), w2_ref[l], preferred_element_type=jnp.float32)
               + hvec_ref[l * 6 + 3])
        h = _layer_norm(ffn + h, hvec_ref[l * 6 + 4], hvec_ref[l * 6 + 5])

    # ---- classifier over ALL rows (lane-dense (rows, 128) slab, full vst) ---
    out_ref[...] = (jnp.dot(h.astype(bf16), wclf_ref[...],
                            preferred_element_type=jnp.float32)
                    + bclf_ref[...]).astype(out_ref.dtype)


# ------------------------- parameter initialization --------------------------
def init_params(key, task2classes):
    keys = iter(jax.random.split(key, 256))

    def dense(kin, kout):
        return {"w": jax.random.normal(next(keys), (kin, kout), jnp.float32) * 0.02,
                "b": jnp.zeros((kout,), jnp.float32)}

    bert = {
        "word_emb": jax.random.normal(next(keys), (VOCAB, HIDDEN), jnp.float32) * 0.02,
        "pos_emb": jax.random.normal(next(keys), (MAX_POS, HIDDEN), jnp.float32) * 0.02,
        "type_emb": jax.random.normal(next(keys), (TYPE_VOCAB, HIDDEN), jnp.float32) * 0.02,
        "emb_ln_g": jnp.ones((HIDDEN,), jnp.float32),
        "emb_ln_b": jnp.zeros((HIDDEN,), jnp.float32),
        "layers": [],
    }
    for _ in range(N_LAYERS):
        bert["layers"].append({
            "q": dense(HIDDEN, HIDDEN),
            "k": dense(HIDDEN, HIDDEN),
            "v": dense(HIDDEN, HIDDEN),
            "o": dense(HIDDEN, HIDDEN),
            "ln1_g": jnp.ones((HIDDEN,), jnp.float32),
            "ln1_b": jnp.zeros((HIDDEN,), jnp.float32),
            "ffn1": dense(HIDDEN, INTERMEDIATE),
            "ffn2": dense(INTERMEDIATE, HIDDEN),
            "ln2_g": jnp.ones((HIDDEN,), jnp.float32),
            "ln2_b": jnp.zeros((HIDDEN,), jnp.float32),
        })

    clfs = {task: dense(HIDDEN, len(classes)) for task, classes in task2classes.items()}
    return {"bert": bert, "clfs": clfs}


# --------------------------------- forward -----------------------------------
@functools.partial(jax.jit, static_argnames=("task",))
def bert_classifier_forward(params, input_ids, attention_mask, token_type_ids, task):
    B, S = input_ids.shape
    rows = B * S
    p = params["bert"]
    layers = p["layers"]
    L = len(layers)
    bf16 = jnp.bfloat16

    # ---- pack per-layer weights into per-head stacks (tiny, traced once) ----
    # Q/K/V weights split per head: (L*3*NH, HIDDEN, HEAD_DIM), index (l*3+j)*NH+hh
    wqkv = jnp.stack([
        layers[l][name]["w"][:, hh * HEAD_DIM:(hh + 1) * HEAD_DIM]
        for l in range(L) for name in ("q", "k", "v") for hh in range(N_HEADS)
    ]).astype(bf16)
    bqkv = jnp.stack([
        layers[l][name]["b"][hh * HEAD_DIM:(hh + 1) * HEAD_DIM][None, :]
        for l in range(L) for name in ("q", "k", "v") for hh in range(N_HEADS)
    ])                                                        # (L*3*NH, 1, HEAD_DIM)
    # output projection split per head along rows: (L*NH, HEAD_DIM, HIDDEN)
    wo = jnp.stack([
        layers[l]["o"]["w"][hh * HEAD_DIM:(hh + 1) * HEAD_DIM, :]
        for l in range(L) for hh in range(N_HEADS)
    ]).astype(bf16)
    # grouped 1-row per-layer params: [bo, ln1g, ln1b, b2, ln2g, ln2b] per layer
    hvec = jnp.stack([
        vec[None, :]
        for l in range(L)
        for vec in (layers[l]["o"]["b"], layers[l]["ln1_g"], layers[l]["ln1_b"],
                    layers[l]["ffn2"]["b"], layers[l]["ln2_g"], layers[l]["ln2_b"])
    ])                                                        # (L*6, 1, HIDDEN)
    b1 = jnp.stack([layers[l]["ffn1"]["b"][None, :] for l in range(L)])   # (L,1,I)
    w1 = jnp.stack([layers[l]["ffn1"]["w"] for l in range(L)]).astype(bf16)
    w2 = jnp.stack([layers[l]["ffn2"]["w"] for l in range(L)]).astype(bf16)
    embln = jnp.stack([p["emb_ln_g"][None, :], p["emb_ln_b"][None, :]])   # (2,1,H)

    # classifier head, lane-padded to 128 columns
    head = params["clfs"][task]
    C = head["w"].shape[1]
    c_pad = max(128, ((C + 127) // 128) * 128)
    wclf = jnp.zeros((HIDDEN, c_pad), jnp.float32).at[:, :C].set(head["w"]).astype(bf16)
    bclf = jnp.zeros((1, c_pad), jnp.float32).at[:, :C].set(head["b"])

    # ---- data-side precomputation (static positions, tiny type-emb gather) ---
    ids = input_ids.reshape(rows, 1).astype(jnp.int32)
    pos_slab = jnp.tile(p["pos_emb"][:S], (B, 1))                         # (rows, H)
    type_slab = jnp.take(p["type_emb"], token_type_ids.reshape(rows), axis=0)
    static_emb = pos_slab + type_slab                                     # (rows, H)

    # combined additive mask: block-diagonal over batches + key padding
    block = jnp.kron(jnp.eye(B, dtype=jnp.float32), jnp.ones((S, S), jnp.float32))
    key_valid = attention_mask.astype(jnp.float32).reshape(1, rows)
    full_mask = (1.0 - block * key_valid) * NEG_INF                       # (rows, rows)

    kernel = functools.partial(_fused_bert_kernel, batch=B, seq=S, n_layers=L,
                               n_heads=N_HEADS, head_dim=HEAD_DIM)
    n_inputs = 14
    in_specs = [pl.BlockSpec(memory_space=pltpu.MemorySpace.VMEM)
                for _ in range(n_inputs)]

    out_pad = pl.pallas_call(
        kernel,
        out_shape=jax.ShapeDtypeStruct((rows, c_pad), jnp.float32),
        in_specs=in_specs,
        out_specs=pl.BlockSpec(memory_space=pltpu.MemorySpace.VMEM),
    )(ids, full_mask, static_emb, p["word_emb"].astype(bf16), embln,
      wqkv, bqkv, wo, hvec, b1, w1, w2, wclf, bclf)

    # CLS rows are 0, S, 2S, ...; real class columns are the first C lanes.
    return out_pad[0::S, :C]


# ----------------------------------- main ------------------------------------
if __name__ == "__main__":
    key = jax.random.PRNGKey(0)
    task2classes = {"sentiment": ["neg", "neu", "pos"],
                    "topic": ["a", "b", "c", "d", "e"]}
    params = init_params(key, task2classes)

    B, S = 2, 8
    k_ids, _ = jax.random.split(key)
    input_ids = jax.random.randint(k_ids, (B, S), 0, VOCAB, dtype=jnp.int32)
    attention_mask = jnp.array([[1, 1, 1, 1, 1, 1, 1, 1],
                                [1, 1, 1, 1, 1, 0, 0, 0]], dtype=jnp.int32)
    token_type_ids = jnp.array([[0, 0, 0, 0, 1, 1, 1, 1],
                                [0, 0, 0, 1, 1, 0, 0, 0]], dtype=jnp.int32)

    logits = bert_classifier_forward(params, input_ids, attention_mask,
                                     token_type_ids, task="sentiment")
    logits = jax.block_until_ready(logits)
    assert logits.shape == (B, len(task2classes["sentiment"]))
    assert bool(jnp.all(jnp.isfinite(logits)))
    print("KERNEL_OK")
</pallas_src>

<mosaic_0001>
module attributes {stable_mosaic.version = 11 : i64} {
  func.func @_fused_bert_kernel(%arg0: memref<16x1xi32, #tpu.memory_space<vmem>>, %arg1: memref<16x16xf32, #tpu.memory_space<vmem>>, %arg2: memref<16x32xf32, #tpu.memory_space<vmem>>, %arg3: memref<64x32xbf16, #tpu.memory_space<vmem>>, %arg4: memref<2x1x32xf32, #tpu.memory_space<vmem>>, %arg5: memref<12x32x16xbf16, #tpu.memory_space<vmem>>, %arg6: memref<12x1x16xf32, #tpu.memory_space<vmem>>, %arg7: memref<4x16x32xbf16, #tpu.memory_space<vmem>>, %arg8: memref<12x1x32xf32, #tpu.memory_space<vmem>>, %arg9: memref<2x1x64xf32, #tpu.memory_space<vmem>>, %arg10: memref<2x32x64xbf16, #tpu.memory_space<vmem>>, %arg11: memref<2x64x32xbf16, #tpu.memory_space<vmem>>, %arg12: memref<32x128xbf16, #tpu.memory_space<vmem>>, %arg13: memref<1x128xf32, #tpu.memory_space<vmem>>, %arg14: memref<16x128xf32, #tpu.memory_space<vmem>>) attributes {dimension_semantics = [], scalar_prefetch = 0 : i64, scratch_operands = 0 : i64, tpu.core_type = #tpu.core_type<tc>} {
    %c0 = arith.constant 0 : index
    %c0_0 = arith.constant 0 : index
    %0 = vector.load %arg0[%c0, %c0_0] : memref<16x1xi32, #tpu.memory_space<vmem>>, vector<16x1xi32>
    %1 = tpu.iota {dimensions = array<i32: 1>} : vector<16x64xi32>
    %2 = vector.broadcast %0 : vector<16x1xi32> to vector<16x64xi32>
    %3 = arith.cmpi eq, %1, %2 : vector<16x64xi32>
    %cst = arith.constant 1.000000e+00 : f32
    %cst_1 = arith.constant 0.000000e+00 : f32
    %4 = vector.broadcast %cst : f32 to vector<16x64xf32>
    %5 = vector.broadcast %cst_1 : f32 to vector<16x64xf32>
    %6 = arith.select %3, %4, %5 : vector<16x64xi1>, vector<16x64xf32>
    %7 = arith.truncf %6 : vector<16x64xf32> to vector<16x64xbf16>
    %c0_2 = arith.constant 0 : index
    %c0_3 = arith.constant 0 : index
    %8 = vector.load %arg3[%c0_2, %c0_3] : memref<64x32xbf16, #tpu.memory_space<vmem>>, vector<64x32xbf16>
    %cst_4 = arith.constant dense<0.000000e+00> : vector<16x32xf32>
    %9 = tpu.matmul %7, %8, %cst_4 {dimension_numbers = #tpu.dot_dimension_numbers<[1], [0], [0], [1], [0, 0, 1, 1], [], []>} : vector<16x64xbf16>, vector<64x32xbf16>, vector<16x32xf32> -> vector<16x32xf32>
    %c0_5 = arith.constant 0 : index
    %c0_6 = arith.constant 0 : index
    %10 = vector.load %arg2[%c0_5, %c0_6] : memref<16x32xf32, #tpu.memory_space<vmem>>, vector<16x32xf32>
    %11 = arith.addf %9, %10 : vector<16x32xf32>
    %c0_7 = arith.constant 0 : index
    %c0_8 = arith.constant 0 : index
    %c0_9 = arith.constant 0 : index
    %12 = vector.load %arg4[%c0_7, %c0_8, %c0_9] : memref<2x1x32xf32, #tpu.memory_space<vmem>>, vector<1x1x32xf32>
    %13 = vector.shape_cast %12 : vector<1x1x32xf32> to vector<1x32xf32>
    %c1 = arith.constant 1 : index
    %c0_10 = arith.constant 0 : index
    %c0_11 = arith.constant 0 : index
    %14 = vector.load %arg4[%c1, %c0_10, %c0_11] : memref<2x1x32xf32, #tpu.memory_space<vmem>>, vector<1x1x32xf32>
    %15 = vector.shape_cast %14 : vector<1x1x32xf32> to vector<1x32xf32>
    %cst_12 = arith.constant dense<0.000000e+00> : vector<16xf32>
    %16 = vector.multi_reduction <add>, %11, %cst_12 [1] : vector<16x32xf32> to vector<16xf32>
    %17 = vector.shape_cast %16 : vector<16xf32> to vector<16x1xf32>
    %cst_13 = arith.constant 3.200000e+01 : f32
    %18 = vector.broadcast %cst_13 : f32 to vector<16x1xf32>
    %19 = arith.divf %17, %18 : vector<16x1xf32>
    %20 = vector.broadcast %19 : vector<16x1xf32> to vector<16x32xf32>
    %21 = arith.subf %11, %20 : vector<16x32xf32>
    %22 = arith.mulf %21, %21 : vector<16x32xf32>
    %cst_14 = arith.constant dense<0.000000e+00> : vector<16xf32>
    %23 = vector.multi_reduction <add>, %22, %cst_14 [1] : vector<16x32xf32> to vector<16xf32>
    %24 = vector.shape_cast %23 : vector<16xf32> to vector<16x1xf32>
    %cst_15 = arith.constant 3.200000e+01 : f32
    %25 = vector.broadcast %cst_15 : f32 to vector<16x1xf32>
    %26 = arith.divf %24, %25 : vector<16x1xf32>
    %cst_16 = arith.constant 9.99999996E-13 : f32
    %27 = vector.broadcast %cst_16 : f32 to vector<16x1xf32>
    %28 = arith.addf %26, %27 : vector<16x1xf32>
    %29 = math.rsqrt %28 : vector<16x1xf32>
    %30 = vector.broadcast %29 : vector<16x1xf32> to vector<16x32xf32>
    %31 = arith.mulf %21, %30 : vector<16x32xf32>
    %32 = vector.broadcast %13 : vector<1x32xf32> to vector<16x32xf32>
    %33 = arith.mulf %31, %32 : vector<16x32xf32>
    %34 = vector.broadcast %15 : vector<1x32xf32> to vector<16x32xf32>
    %35 = arith.addf %33, %34 : vector<16x32xf32>
    %c0_17 = arith.constant 0 : index
    %c0_18 = arith.constant 0 : index
    %36 = vector.load %arg1[%c0_17, %c0_18] : memref<16x16xf32, #tpu.memory_space<vmem>>, vector<16x16xf32>
    %37 = arith.truncf %35 : vector<16x32xf32> to vector<16x32xbf16>
    %cst_19 = arith.constant 0.000000e+00 : f32
    %38 = vector.broadcast %cst_19 : f32 to vector<16x32xf32>
    %c0_20 = arith.constant 0 : index
    %c0_21 = arith.constant 0 : index
    %c0_22 = arith.constant 0 : index
    %39 = vector.load %arg5[%c0_20, %c0_21, %c0_22] : memref<12x32x16xbf16, #tpu.memory_space<vmem>>, vector<1x32x16xbf16>
    %40 = vector.shape_cast %39 : vector<1x32x16xbf16> to vector<32x16xbf16>
    %cst_23 = arith.constant dense<0.000000e+00> : vector<16x16xf32>
    %41 = tpu.matmul %37, %40, %cst_23 {dimension_numbers = #tpu.dot_dimension_numbers<[1], [0], [0], [1], [0, 0, 1, 1], [], []>} : vector<16x32xbf16>, vector<32x16xbf16>, vector<16x16xf32> -> vector<16x16xf32>
    %c0_24 = arith.constant 0 : index
    %c0_25 = arith.constant 0 : index
    %c0_26 = arith.constant 0 : index
    %42 = vector.load %arg6[%c0_24, %c0_25, %c0_26] : memref<12x1x16xf32, #tpu.memory_space<vmem>>, vector<1x1x16xf32>
    %43 = vector.shape_cast %42 : vector<1x1x16xf32> to vector<1x16xf32>
    %44 = vector.broadcast %43 : vector<1x16xf32> to vector<16x16xf32>
    %45 = arith.addf %41, %44 : vector<16x16xf32>
    %c2 = arith.constant 2 : index
    %c0_27 = arith.constant 0 : index
    %c0_28 = arith.constant 0 : index
    %46 = vector.load %arg5[%c2, %c0_27, %c0_28] : memref<12x32x16xbf16, #tpu.memory_space<vmem>>, vector<1x32x16xbf16>
    %47 = vector.shape_cast %46 : vector<1x32x16xbf16> to vector<32x16xbf16>
    %cst_29 = arith.constant dense<0.000000e+00> : vector<16x16xf32>
    %48 = tpu.matmul %37, %47, %cst_29 {dimension_numbers = #tpu.dot_dimension_numbers<[1], [0], [0], [1], [0, 0, 1, 1], [], []>} : vector<16x32xbf16>, vector<32x16xbf16>, vector<16x16xf32> -> vector<16x16xf32>
    %c2_30 = arith.constant 2 : index
    %c0_31 = arith.constant 0 : index
    %c0_32 = arith.constant 0 : index
    %49 = vector.load %arg6[%c2_30, %c0_31, %c0_32] : memref<12x1x16xf32, #tpu.memory_space<vmem>>, vector<1x1x16xf32>
    %50 = vector.shape_cast %49 : vector<1x1x16xf32> to vector<1x16xf32>
    %51 = vector.broadcast %50 : vector<1x16xf32> to vector<16x16xf32>
    %52 = arith.addf %48, %51 : vector<16x16xf32>
    %c4 = arith.constant 4 : index
    %c0_33 = arith.constant 0 : index
    %c0_34 = arith.constant 0 : index
    %53 = vector.load %arg5[%c4, %c0_33, %c0_34] : memref<12x32x16xbf16, #tpu.memory_space<vmem>>, vector<1x32x16xbf16>
    %54 = vector.shape_cast %53 : vector<1x32x16xbf16> to vector<32x16xbf16>
    %cst_35 = arith.constant dense<0.000000e+00> : vector<16x16xf32>
    %55 = tpu.matmul %37, %54, %cst_35 {dimension_numbers = #tpu.dot_dimension_numbers<[1], [0], [0], [1], [0, 0, 1, 1], [], []>} : vector<16x32xbf16>, vector<32x16xbf16>, vector<16x16xf32> -> vector<16x16xf32>
    %c4_36 = arith.constant 4 : index
    %c0_37 = arith.constant 0 : index
    %c0_38 = arith.constant 0 : index
    %56 = vector.load %arg6[%c4_36, %c0_37, %c0_38] : memref<12x1x16xf32, #tpu.memory_space<vmem>>, vector<1x1x16xf32>
    %57 = vector.shape_cast %56 : vector<1x1x16xf32> to vector<1x16xf32>
    %58 = vector.broadcast %57 : vector<1x16xf32> to vector<16x16xf32>
    %59 = arith.addf %55, %58 : vector<16x16xf32>
    %60 = arith.truncf %45 : vector<16x16xf32> to vector<16x16xbf16>
    %61 = arith.truncf %52 : vector<16x16xf32> to vector<16x16xbf16>
    %cst_39 = arith.constant dense<0.000000e+00> : vector<16x16xf32>
    %62 = tpu.matmul %60, %61, %cst_39 {dimension_numbers = #tpu.dot_dimension_numbers<[1], [1], [0], [0], [0, 0, 1, 0], [], []>} : vector<16x16xbf16>, vector<16x16xbf16>, vector<16x16xf32> -> vector<16x16xf32>
    %cst_40 = arith.constant 2.500000e-01 : f32
    %63 = vector.broadcast %cst_40 : f32 to vector<16x16xf32>
    %64 = arith.mulf %62, %63 : vector<16x16xf32>
    %65 = arith.addf %64, %36 : vector<16x16xf32>
    %cst_41 = arith.constant dense<0xFF800000> : vector<16xf32>
    %66 = vector.multi_reduction <maximumf>, %65, %cst_41 [1] : vector<16x16xf32> to vector<16xf32>
    %67 = vector.shape_cast %66 : vector<16xf32> to vector<16x1xf32>
    %68 = vector.broadcast %67 : vector<16x1xf32> to vector<16x16xf32>
    %69 = arith.subf %65, %68 : vector<16x16xf32>
    %70 = math.exp %69 : vector<16x16xf32>
    %cst_42 = arith.constant dense<0.000000e+00> : vector<16xf32>
    %71 = vector.multi_reduction <add>, %70, %cst_42 [1] : vector<16x16xf32> to vector<16xf32>
    %72 = vector.shape_cast %71 : vector<16xf32> to vector<16x1xf32>
    %73 = tpu.reciprocal %72 {approx = true} : vector<16x1xf32> -> vector<16x1xf32>
    %74 = vector.broadcast %73 : vector<16x1xf32> to vector<16x16xf32>
    %75 = arith.mulf %70, %74 : vector<16x16xf32>
    %76 = arith.truncf %75 : vector<16x16xf32> to vector<16x16xbf16>
    %77 = arith.truncf %59 : vector<16x16xf32> to vector<16x16xbf16>
    %cst_43 = arith.constant dense<0.000000e+00> : vector<16x16xf32>
    %78 = tpu.matmul %76, %77, %cst_43 {dimension_numbers = #tpu.dot_dimension_numbers<[1], [0], [0], [1], [0, 0, 1, 1], [], []>} : vector<16x16xbf16>, vector<16x16xbf16>, vector<16x16xf32> -> vector<16x16xf32>
    %79 = arith.truncf %78 : vector<16x16xf32> to vector<16x16xbf16>
    %c0_44 = arith.constant 0 : index
    %c0_45 = arith.constant 0 : index
    %c0_46 = arith.constant 0 : index
    %80 = vector.load %arg7[%c0_44, %c0_45, %c0_46] : memref<4x16x32xbf16, #tpu.memory_space<vmem>>, vector<1x16x32xbf16>
    %81 = vector.shape_cast %80 : vector<1x16x32xbf16> to vector<16x32xbf16>
    %cst_47 = arith.constant dense<0.000000e+00> : vector<16x32xf32>
    %82 = tpu.matmul %79, %81, %cst_47 {dimension_numbers = #tpu.dot_dimension_numbers<[1], [0], [0], [1], [0, 0, 1, 1], [], []>} : vector<16x16xbf16>, vector<16x32xbf16>, vector<16x32xf32> -> vector<16x32xf32>
    %83 = arith.addf %38, %82 : vector<16x32xf32>
    %c1_48 = arith.constant 1 : index
    %c0_49 = arith.constant 0 : index
    %c0_50 = arith.constant 0 : index
    %84 = vector.load %arg5[%c1_48, %c0_49, %c0_50] : memref<12x32x16xbf16, #tpu.memory_space<vmem>>, vector<1x32x16xbf16>
    %85 = vector.shape_cast %84 : vector<1x32x16xbf16> to vector<32x16xbf16>
    %cst_51 = arith.constant dense<0.000000e+00> : vector<16x16xf32>
    %86 = tpu.matmul %37, %85, %cst_51 {dimension_numbers = #tpu.dot_dimension_numbers<[1], [0], [0], [1], [0, 0, 1, 1], [], []>} : vector<16x32xbf16>, vector<32x16xbf16>, vector<16x16xf32> -> vector<16x16xf32>
    %c1_52 = arith.constant 1 : index
    %c0_53 = arith.constant 0 : index
    %c0_54 = arith.constant 0 : index
    %87 = vector.load %arg6[%c1_52, %c0_53, %c0_54] : memref<12x1x16xf32, #tpu.memory_space<vmem>>, vector<1x1x16xf32>
    %88 = vector.shape_cast %87 : vector<1x1x16xf32> to vector<1x16xf32>
    %89 = vector.broadcast %88 : vector<1x16xf32> to vector<16x16xf32>
    %90 = arith.addf %86, %89 : vector<16x16xf32>
    %c3 = arith.constant 3 : index
    %c0_55 = arith.constant 0 : index
    %c0_56 = arith.constant 0 : index
    %91 = vector.load %arg5[%c3, %c0_55, %c0_56] : memref<12x32x16xbf16, #tpu.memory_space<vmem>>, vector<1x32x16xbf16>
    %92 = vector.shape_cast %91 : vector<1x32x16xbf16> to vector<32x16xbf16>
    %cst_57 = arith.constant dense<0.000000e+00> : vector<16x16xf32>
    %93 = tpu.matmul %37, %92, %cst_57 {dimension_numbers = #tpu.dot_dimension_numbers<[1], [0], [0], [1], [0, 0, 1, 1], [], []>} : vector<16x32xbf16>, vector<32x16xbf16>, vector<16x16xf32> -> vector<16x16xf32>
    %c3_58 = arith.constant 3 : index
    %c0_59 = arith.constant 0 : index
    %c0_60 = arith.constant 0 : index
    %94 = vector.load %arg6[%c3_58, %c0_59, %c0_60] : memref<12x1x16xf32, #tpu.memory_space<vmem>>, vector<1x1x16xf32>
    %95 = vector.shape_cast %94 : vector<1x1x16xf32> to vector<1x16xf32>
    %96 = vector.broadcast %95 : vector<1x16xf32> to vector<16x16xf32>
    %97 = arith.addf %93, %96 : vector<16x16xf32>
    %c5 = arith.constant 5 : index
    %c0_61 = arith.constant 0 : index
    %c0_62 = arith.constant 0 : index
    %98 = vector.load %arg5[%c5, %c0_61, %c0_62] : memref<12x32x16xbf16, #tpu.memory_space<vmem>>, vector<1x32x16xbf16>
    %99 = vector.shape_cast %98 : vector<1x32x16xbf16> to vector<32x16xbf16>
    %cst_63 = arith.constant dense<0.000000e+00> : vector<16x16xf32>
    %100 = tpu.matmul %37, %99, %cst_63 {dimension_numbers = #tpu.dot_dimension_numbers<[1], [0], [0], [1], [0, 0, 1, 1], [], []>} : vector<16x32xbf16>, vector<32x16xbf16>, vector<16x16xf32> -> vector<16x16xf32>
    %c5_64 = arith.constant 5 : index
    %c0_65 = arith.constant 0 : index
    %c0_66 = arith.constant 0 : index
    %101 = vector.load %arg6[%c5_64, %c0_65, %c0_66] : memref<12x1x16xf32, #tpu.memory_space<vmem>>, vector<1x1x16xf32>
    %102 = vector.shape_cast %101 : vector<1x1x16xf32> to vector<1x16xf32>
    %103 = vector.broadcast %102 : vector<1x16xf32> to vector<16x16xf32>
    %104 = arith.addf %100, %103 : vector<16x16xf32>
    %105 = arith.truncf %90 : vector<16x16xf32> to vector<16x16xbf16>
    %106 = arith.truncf %97 : vector<16x16xf32> to vector<16x16xbf16>
    %cst_67 = arith.constant dense<0.000000e+00> : vector<16x16xf32>
    %107 = tpu.matmul %105, %106, %cst_67 {dimension_numbers = #tpu.dot_dimension_numbers<[1], [1], [0], [0], [0, 0, 1, 0], [], []>} : vector<16x16xbf16>, vector<16x16xbf16>, vector<16x16xf32> -> vector<16x16xf32>
    %cst_68 = arith.constant 2.500000e-01 : f32
    %108 = vector.broadcast %cst_68 : f32 to vector<16x16xf32>
    %109 = arith.mulf %107, %108 : vector<16x16xf32>
    %110 = arith.addf %109, %36 : vector<16x16xf32>
    %cst_69 = arith.constant dense<0xFF800000> : vector<16xf32>
    %111 = vector.multi_reduction <maximumf>, %110, %cst_69 [1] : vector<16x16xf32> to vector<16xf32>
    %112 = vector.shape_cast %111 : vector<16xf32> to vector<16x1xf32>
    %113 = vector.broadcast %112 : vector<16x1xf32> to vector<16x16xf32>
    %114 = arith.subf %110, %113 : vector<16x16xf32>
    %115 = math.exp %114 : vector<16x16xf32>
    %cst_70 = arith.constant dense<0.000000e+00> : vector<16xf32>
    %116 = vector.multi_reduction <add>, %115, %cst_70 [1] : vector<16x16xf32> to vector<16xf32>
    %117 = vector.shape_cast %116 : vector<16xf32> to vector<16x1xf32>
    %118 = tpu.reciprocal %117 {approx = true} : vector<16x1xf32> -> vector<16x1xf32>
    %119 = vector.broadcast %118 : vector<16x1xf32> to vector<16x16xf32>
    %120 = arith.mulf %115, %119 : vector<16x16xf32>
    %121 = arith.truncf %120 : vector<16x16xf32> to vector<16x16xbf16>
    %122 = arith.truncf %104 : vector<16x16xf32> to vector<16x16xbf16>
    %cst_71 = arith.constant dense<0.000000e+00> : vector<16x16xf32>
    %123 = tpu.matmul %121, %122, %cst_71 {dimension_numbers = #tpu.dot_dimension_numbers<[1], [0], [0], [1], [0, 0, 1, 1], [], []>} : vector<16x16xbf16>, vector<16x16xbf16>, vector<16x16xf32> -> vector<16x16xf32>
    %124 = arith.truncf %123 : vector<16x16xf32> to vector<16x16xbf16>
    %c1_72 = arith.constant 1 : index
    %c0_73 = arith.constant 0 : index
    %c0_74 = arith.constant 0 : index
    %125 = vector.load %arg7[%c1_72, %c0_73, %c0_74] : memref<4x16x32xbf16, #tpu.memory_space<vmem>>, vector<1x16x32xbf16>
    %126 = vector.shape_cast %125 : vector<1x16x32xbf16> to vector<16x32xbf16>
    %cst_75 = arith.constant dense<0.000000e+00> : vector<16x32xf32>
    %127 = tpu.matmul %124, %126, %cst_75 {dimension_numbers = #tpu.dot_dimension_numbers<[1], [0], [0], [1], [0, 0, 1, 1], [], []>} : vector<16x16xbf16>, vector<16x32xbf16>, vector<16x32xf32> -> vector<16x32xf32>
    %128 = arith.addf %83, %127 : vector<16x32xf32>
    %c0_76 = arith.constant 0 : index
    %c0_77 = arith.constant 0 : index
    %c0_78 = arith.constant 0 : index
    %129 = vector.load %arg8[%c0_76, %c0_77, %c0_78] : memref<12x1x32xf32, #tpu.memory_space<vmem>>, vector<1x1x32xf32>
    %130 = vector.shape_cast %129 : vector<1x1x32xf32> to vector<1x32xf32>
    %131 = vector.broadcast %130 : vector<1x32xf32> to vector<16x32xf32>
    %132 = arith.addf %128, %131 : vector<16x32xf32>
    %133 = arith.addf %132, %35 : vector<16x32xf32>
    %c1_79 = arith.constant 1 : index
    %c0_80 = arith.constant 0 : index
    %c0_81 = arith.constant 0 : index
    %134 = vector.load %arg8[%c1_79, %c0_80, %c0_81] : memref<12x1x32xf32, #tpu.memory_space<vmem>>, vector<1x1x32xf32>
    %135 = vector.shape_cast %134 : vector<1x1x32xf32> to vector<1x32xf32>
    %c2_82 = arith.constant 2 : index
    %c0_83 = arith.constant 0 : index
    %c0_84 = arith.constant 0 : index
    %136 = vector.load %arg8[%c2_82, %c0_83, %c0_84] : memref<12x1x32xf32, #tpu.memory_space<vmem>>, vector<1x1x32xf32>
    %137 = vector.shape_cast %136 : vector<1x1x32xf32> to vector<1x32xf32>
    %cst_85 = arith.constant dense<0.000000e+00> : vector<16xf32>
    %138 = vector.multi_reduction <add>, %133, %cst_85 [1] : vector<16x32xf32> to vector<16xf32>
    %139 = vector.shape_cast %138 : vector<16xf32> to vector<16x1xf32>
    %cst_86 = arith.constant 3.200000e+01 : f32
    %140 = vector.broadcast %cst_86 : f32 to vector<16x1xf32>
    %141 = arith.divf %139, %140 : vector<16x1xf32>
    %142 = vector.broadcast %141 : vector<16x1xf32> to vector<16x32xf32>
    %143 = arith.subf %133, %142 : vector<16x32xf32>
    %144 = arith.mulf %143, %143 : vector<16x32xf32>
    %cst_87 = arith.constant dense<0.000000e+00> : vector<16xf32>
    %145 = vector.multi_reduction <add>, %144, %cst_87 [1] : vector<16x32xf32> to vector<16xf32>
    %146 = vector.shape_cast %145 : vector<16xf32> to vector<16x1xf32>
    %cst_88 = arith.constant 3.200000e+01 : f32
    %147 = vector.broadcast %cst_88 : f32 to vector<16x1xf32>
    %148 = arith.divf %146, %147 : vector<16x1xf32>
    %cst_89 = arith.constant 9.99999996E-13 : f32
    %149 = vector.broadcast %cst_89 : f32 to vector<16x1xf32>
    %150 = arith.addf %148, %149 : vector<16x1xf32>
    %151 = math.rsqrt %150 : vector<16x1xf32>
    %152 = vector.broadcast %151 : vector<16x1xf32> to vector<16x32xf32>
    %153 = arith.mulf %143, %152 : vector<16x32xf32>
    %154 = vector.broadcast %135 : vector<1x32xf32> to vector<16x32xf32>
    %155 = arith.mulf %153, %154 : vector<16x32xf32>
    %156 = vector.broadcast %137 : vector<1x32xf32> to vector<16x32xf32>
    %157 = arith.addf %155, %156 : vector<16x32xf32>
    %158 = arith.truncf %157 : vector<16x32xf32> to vector<16x32xbf16>
    %c0_90 = arith.constant 0 : index
    %c0_91 = arith.constant 0 : index
    %c0_92 = arith.constant 0 : index
    %159 = vector.load %arg10[%c0_90, %c0_91, %c0_92] : memref<2x32x64xbf16, #tpu.memory_space<vmem>>, vector<1x32x64xbf16>
    %160 = vector.shape_cast %159 : vector<1x32x64xbf16> to vector<32x64xbf16>
    %cst_93 = arith.constant dense<0.000000e+00> : vector<16x64xf32>
    %161 = tpu.matmul %158, %160, %cst_93 {dimension_numbers = #tpu.dot_dimension_numbers<[1], [0], [0], [1], [0, 0, 1, 1], [], []>} : vector<16x32xbf16>, vector<32x64xbf16>, vector<16x64xf32> -> vector<16x64xf32>
    %c0_94 = arith.constant 0 : index
    %c0_95 = arith.constant 0 : index
    %c0_96 = arith.constant 0 : index
    %162 = vector.load %arg9[%c0_94, %c0_95, %c0_96] : memref<2x1x64xf32, #tpu.memory_space<vmem>>, vector<1x1x64xf32>
    %163 = vector.shape_cast %162 : vector<1x1x64xf32> to vector<1x64xf32>
    %164 = vector.broadcast %163 : vector<1x64xf32> to vector<16x64xf32>
    %165 = arith.addf %161, %164 : vector<16x64xf32>
    %cst_97 = arith.constant 5.000000e-01 : f32
    %166 = vector.broadcast %cst_97 : f32 to vector<16x64xf32>
    %167 = arith.mulf %166, %165 : vector<16x64xf32>
    %cst_98 = arith.constant 4.471500e-02 : f32
    %168 = vector.broadcast %cst_98 : f32 to vector<16x64xf32>
    %169 = arith.mulf %168, %165 : vector<16x64xf32>
    %170 = arith.mulf %169, %165 : vector<16x64xf32>
    %171 = arith.mulf %170, %165 : vector<16x64xf32>
    %172 = arith.addf %165, %171 : vector<16x64xf32>
    %cst_99 = arith.constant 0.797884583 : f32
    %173 = vector.broadcast %cst_99 : f32 to vector<16x64xf32>
    %174 = arith.mulf %173, %172 : vector<16x64xf32>
    %175 = math.tanh %174 : vector<16x64xf32>
    %cst_100 = arith.constant 1.000000e+00 : f32
    %176 = vector.broadcast %cst_100 : f32 to vector<16x64xf32>
    %177 = arith.addf %176, %175 : vector<16x64xf32>
    %178 = arith.mulf %167, %177 : vector<16x64xf32>
    %179 = arith.truncf %178 : vector<16x64xf32> to vector<16x64xbf16>
    %c0_101 = arith.constant 0 : index
    %c0_102 = arith.constant 0 : index
    %c0_103 = arith.constant 0 : index
    %180 = vector.load %arg11[%c0_101, %c0_102, %c0_103] : memref<2x64x32xbf16, #tpu.memory_space<vmem>>, vector<1x64x32xbf16>
    %181 = vector.shape_cast %180 : vector<1x64x32xbf16> to vector<64x32xbf16>
    %cst_104 = arith.constant dense<0.000000e+00> : vector<16x32xf32>
    %182 = tpu.matmul %179, %181, %cst_104 {dimension_numbers = #tpu.dot_dimension_numbers<[1], [0], [0], [1], [0, 0, 1, 1], [], []>} : vector<16x64xbf16>, vector<64x32xbf16>, vector<16x32xf32> -> vector<16x32xf32>
    %c3_105 = arith.constant 3 : index
    %c0_106 = arith.constant 0 : index
    %c0_107 = arith.constant 0 : index
    %183 = vector.load %arg8[%c3_105, %c0_106, %c0_107] : memref<12x1x32xf32, #tpu.memory_space<vmem>>, vector<1x1x32xf32>
    %184 = vector.shape_cast %183 : vector<1x1x32xf32> to vector<1x32xf32>
    %185 = vector.broadcast %184 : vector<1x32xf32> to vector<16x32xf32>
    %186 = arith.addf %182, %185 : vector<16x32xf32>
    %187 = arith.addf %186, %157 : vector<16x32xf32>
    %c4_108 = arith.constant 4 : index
    %c0_109 = arith.constant 0 : index
    %c0_110 = arith.constant 0 : index
    %188 = vector.load %arg8[%c4_108, %c0_109, %c0_110] : memref<12x1x32xf32, #tpu.memory_space<vmem>>, vector<1x1x32xf32>
    %189 = vector.shape_cast %188 : vector<1x1x32xf32> to vector<1x32xf32>
    %c5_111 = arith.constant 5 : index
    %c0_112 = arith.constant 0 : index
    %c0_113 = arith.constant 0 : index
    %190 = vector.load %arg8[%c5_111, %c0_112, %c0_113] : memref<12x1x32xf32, #tpu.memory_space<vmem>>, vector<1x1x32xf32>
    %191 = vector.shape_cast %190 : vector<1x1x32xf32> to vector<1x32xf32>
    %cst_114 = arith.constant dense<0.000000e+00> : vector<16xf32>
    %192 = vector.multi_reduction <add>, %187, %cst_114 [1] : vector<16x32xf32> to vector<16xf32>
    %193 = vector.shape_cast %192 : vector<16xf32> to vector<16x1xf32>
    %cst_115 = arith.constant 3.200000e+01 : f32
    %194 = vector.broadcast %cst_115 : f32 to vector<16x1xf32>
    %195 = arith.divf %193, %194 : vector<16x1xf32>
    %196 = vector.broadcast %195 : vector<16x1xf32> to vector<16x32xf32>
    %197 = arith.subf %187, %196 : vector<16x32xf32>
    %198 = arith.mulf %197, %197 : vector<16x32xf32>
    %cst_116 = arith.constant dense<0.000000e+00> : vector<16xf32>
    %199 = vector.multi_reduction <add>, %198, %cst_116 [1] : vector<16x32xf32> to vector<16xf32>
    %200 = vector.shape_cast %199 : vector<16xf32> to vector<16x1xf32>
    %cst_117 = arith.constant 3.200000e+01 : f32
    %201 = vector.broadcast %cst_117 : f32 to vector<16x1xf32>
    %202 = arith.divf %200, %201 : vector<16x1xf32>
    %cst_118 = arith.constant 9.99999996E-13 : f32
    %203 = vector.broadcast %cst_118 : f32 to vector<16x1xf32>
    %204 = arith.addf %202, %203 : vector<16x1xf32>
    %205 = math.rsqrt %204 : vector<16x1xf32>
    %206 = vector.broadcast %205 : vector<16x1xf32> to vector<16x32xf32>
    %207 = arith.mulf %197, %206 : vector<16x32xf32>
    %208 = vector.broadcast %189 : vector<1x32xf32> to vector<16x32xf32>
    %209 = arith.mulf %207, %208 : vector<16x32xf32>
    %210 = vector.broadcast %191 : vector<1x32xf32> to vector<16x32xf32>
    %211 = arith.addf %209, %210 : vector<16x32xf32>
    %212 = arith.truncf %211 : vector<16x32xf32> to vector<16x32xbf16>
    %cst_119 = arith.constant 0.000000e+00 : f32
    %213 = vector.broadcast %cst_119 : f32 to vector<16x32xf32>
    %c6 = arith.constant 6 : index
    %c0_120 = arith.constant 0 : index
    %c0_121 = arith.constant 0 : index
    %214 = vector.load %arg5[%c6, %c0_120, %c0_121] : memref<12x32x16xbf16, #tpu.memory_space<vmem>>, vector<1x32x16xbf16>
    %215 = vector.shape_cast %214 : vector<1x32x16xbf16> to vector<32x16xbf16>
    %cst_122 = arith.constant dense<0.000000e+00> : vector<16x16xf32>
    %216 = tpu.matmul %212, %215, %cst_122 {dimension_numbers = #tpu.dot_dimension_numbers<[1], [0], [0], [1], [0, 0, 1, 1], [], []>} : vector<16x32xbf16>, vector<32x16xbf16>, vector<16x16xf32> -> vector<16x16xf32>
    %c6_123 = arith.constant 6 : index
    %c0_124 = arith.constant 0 : index
    %c0_125 = arith.constant 0 : index
    %217 = vector.load %arg6[%c6_123, %c0_124, %c0_125] : memref<12x1x16xf32, #tpu.memory_space<vmem>>, vector<1x1x16xf32>
    %218 = vector.shape_cast %217 : vector<1x1x16xf32> to vector<1x16xf32>
    %219 = vector.broadcast %218 : vector<1x16xf32> to vector<16x16xf32>
    %220 = arith.addf %216, %219 : vector<16x16xf32>
    %c8 = arith.constant 8 : index
    %c0_126 = arith.constant 0 : index
    %c0_127 = arith.constant 0 : index
    %221 = vector.load %arg5[%c8, %c0_126, %c0_127] : memref<12x32x16xbf16, #tpu.memory_space<vmem>>, vector<1x32x16xbf16>
    %222 = vector.shape_cast %221 : vector<1x32x16xbf16> to vector<32x16xbf16>
    %cst_128 = arith.constant dense<0.000000e+00> : vector<16x16xf32>
    %223 = tpu.matmul %212, %222, %cst_128 {dimension_numbers = #tpu.dot_dimension_numbers<[1], [0], [0], [1], [0, 0, 1, 1], [], []>} : vector<16x32xbf16>, vector<32x16xbf16>, vector<16x16xf32> -> vector<16x16xf32>
    %c8_129 = arith.constant 8 : index
    %c0_130 = arith.constant 0 : index
    %c0_131 = arith.constant 0 : index
    %224 = vector.load %arg6[%c8_129, %c0_130, %c0_131] : memref<12x1x16xf32, #tpu.memory_space<vmem>>, vector<1x1x16xf32>
    %225 = vector.shape_cast %224 : vector<1x1x16xf32> to vector<1x16xf32>
    %226 = vector.broadcast %225 : vector<1x16xf32> to vector<16x16xf32>
    %227 = arith.addf %223, %226 : vector<16x16xf32>
    %c10 = arith.constant 10 : index
    %c0_132 = arith.constant 0 : index
    %c0_133 = arith.constant 0 : index
    %228 = vector.load %arg5[%c10, %c0_132, %c0_133] : memref<12x32x16xbf16, #tpu.memory_space<vmem>>, vector<1x32x16xbf16>
    %229 = vector.shape_cast %228 : vector<1x32x16xbf16> to vector<32x16xbf16>
    %cst_134 = arith.constant dense<0.000000e+00> : vector<16x16xf32>
    %230 = tpu.matmul %212, %229, %cst_134 {dimension_numbers = #tpu.dot_dimension_numbers<[1], [0], [0], [1], [0, 0, 1, 1], [], []>} : vector<16x32xbf16>, vector<32x16xbf16>, vector<16x16xf32> -> vector<16x16xf32>
    %c10_135 = arith.constant 10 : index
    %c0_136 = arith.constant 0 : index
    %c0_137 = arith.constant 0 : index
    %231 = vector.load %arg6[%c10_135, %c0_136, %c0_137] : memref<12x1x16xf32, #tpu.memory_space<vmem>>, vector<1x1x16xf32>
    %232 = vector.shape_cast %231 : vector<1x1x16xf32> to vector<1x16xf32>
    %233 = vector.broadcast %232 : vector<1x16xf32> to vector<16x16xf32>
    %234 = arith.addf %230, %233 : vector<16x16xf32>
    %235 = arith.truncf %220 : vector<16x16xf32> to vector<16x16xbf16>
    %236 = arith.truncf %227 : vector<16x16xf32> to vector<16x16xbf16>
    %cst_138 = arith.constant dense<0.000000e+00> : vector<16x16xf32>
    %237 = tpu.matmul %235, %236, %cst_138 {dimension_numbers = #tpu.dot_dimension_numbers<[1], [1], [0], [0], [0, 0, 1, 0], [], []>} : vector<16x16xbf16>, vector<16x16xbf16>, vector<16x16xf32> -> vector<16x16xf32>
    %cst_139 = arith.constant 2.500000e-01 : f32
    %238 = vector.broadcast %cst_139 : f32 to vector<16x16xf32>
    %239 = arith.mulf %237, %238 : vector<16x16xf32>
    %240 = arith.addf %239, %36 : vector<16x16xf32>
    %cst_140 = arith.constant dense<0xFF800000> : vector<16xf32>
    %241 = vector.multi_reduction <maximumf>, %240, %cst_140 [1] : vector<16x16xf32> to vector<16xf32>
    %242 = vector.shape_cast %241 : vector<16xf32> to vector<16x1xf32>
    %243 = vector.broadcast %242 : vector<16x1xf32> to vector<16x16xf32>
    %244 = arith.subf %240, %243 : vector<16x16xf32>
    %245 = math.exp %244 : vector<16x16xf32>
    %cst_141 = arith.constant dense<0.000000e+00> : vector<16xf32>
    %246 = vector.multi_reduction <add>, %245, %cst_141 [1] : vector<16x16xf32> to vector<16xf32>
    %247 = vector.shape_cast %246 : vector<16xf32> to vector<16x1xf32>
    %248 = tpu.reciprocal %247 {approx = true} : vector<16x1xf32> -> vector<16x1xf32>
    %249 = vector.broadcast %248 : vector<16x1xf32> to vector<16x16xf32>
    %250 = arith.mulf %245, %249 : vector<16x16xf32>
    %251 = arith.truncf %250 : vector<16x16xf32> to vector<16x16xbf16>
    %252 = arith.truncf %234 : vector<16x16xf32> to vector<16x16xbf16>
    %cst_142 = arith.constant dense<0.000000e+00> : vector<16x16xf32>
    %253 = tpu.matmul %251, %252, %cst_142 {dimension_numbers = #tpu.dot_dimension_numbers<[1], [0], [0], [1], [0, 0, 1, 1], [], []>} : vector<16x16xbf16>, vector<16x16xbf16>, vector<16x16xf32> -> vector<16x16xf32>
    %254 = arith.truncf %253 : vector<16x16xf32> to vector<16x16xbf16>
    %c2_143 = arith.constant 2 : index
    %c0_144 = arith.constant 0 : index
    %c0_145 = arith.constant 0 : index
    %255 = vector.load %arg7[%c2_143, %c0_144, %c0_145] : memref<4x16x32xbf16, #tpu.memory_space<vmem>>, vector<1x16x32xbf16>
    %256 = vector.shape_cast %255 : vector<1x16x32xbf16> to vector<16x32xbf16>
    %cst_146 = arith.constant dense<0.000000e+00> : vector<16x32xf32>
    %257 = tpu.matmul %254, %256, %cst_146 {dimension_numbers = #tpu.dot_dimension_numbers<[1], [0], [0], [1], [0, 0, 1, 1], [], []>} : vector<16x16xbf16>, vector<16x32xbf16>, vector<16x32xf32> -> vector<16x32xf32>
    %258 = arith.addf %213, %257 : vector<16x32xf32>
    %c7 = arith.constant 7 : index
    %c0_147 = arith.constant 0 : index
    %c0_148 = arith.constant 0 : index
    %259 = vector.load %arg5[%c7, %c0_147, %c0_148] : memref<12x32x16xbf16, #tpu.memory_space<vmem>>, vector<1x32x16xbf16>
    %260 = vector.shape_cast %259 : vector<1x32x16xbf16> to vector<32x16xbf16>
    %cst_149 = arith.constant dense<0.000000e+00> : vector<16x16xf32>
    %261 = tpu.matmul %212, %260, %cst_149 {dimension_numbers = #tpu.dot_dimension_numbers<[1], [0], [0], [1], [0, 0, 1, 1], [], []>} : vector<16x32xbf16>, vector<32x16xbf16>, vector<16x16xf32> -> vector<16x16xf32>
    %c7_150 = arith.constant 7 : index
    %c0_151 = arith.constant 0 : index
    %c0_152 = arith.constant 0 : index
    %262 = vector.load %arg6[%c7_150, %c0_151, %c0_152] : memref<12x1x16xf32, #tpu.memory_space<vmem>>, vector<1x1x16xf32>
    %263 = vector.shape_cast %262 : vector<1x1x16xf32> to vector<1x16xf32>
    %264 = vector.broadcast %263 : vector<1x16xf32> to vector<16x16xf32>
    %265 = arith.addf %261, %264 : vector<16x16xf32>
    %c9 = arith.constant 9 : index
    %c0_153 = arith.constant 0 : index
    %c0_154 = arith.constant 0 : index
    %266 = vector.load %arg5[%c9, %c0_153, %c0_154] : memref<12x32x16xbf16, #tpu.memory_space<vmem>>, vector<1x32x16xbf16>
    %267 = vector.shape_cast %266 : vector<1x32x16xbf16> to vector<32x16xbf16>
    %cst_155 = arith.constant dense<0.000000e+00> : vector<16x16xf32>
    %268 = tpu.matmul %212, %267, %cst_155 {dimension_numbers = #tpu.dot_dimension_numbers<[1], [0], [0], [1], [0, 0, 1, 1], [], []>} : vector<16x32xbf16>, vector<32x16xbf16>, vector<16x16xf32> -> vector<16x16xf32>
    %c9_156 = arith.constant 9 : index
    %c0_157 = arith.constant 0 : index
    %c0_158 = arith.constant 0 : index
    %269 = vector.load %arg6[%c9_156, %c0_157, %c0_158] : memref<12x1x16xf32, #tpu.memory_space<vmem>>, vector<1x1x16xf32>
    %270 = vector.shape_cast %269 : vector<1x1x16xf32> to vector<1x16xf32>
    %271 = vector.broadcast %270 : vector<1x16xf32> to vector<16x16xf32>
    %272 = arith.addf %268, %271 : vector<16x16xf32>
    %c11 = arith.constant 11 : index
    %c0_159 = arith.constant 0 : index
    %c0_160 = arith.constant 0 : index
    %273 = vector.load %arg5[%c11, %c0_159, %c0_160] : memref<12x32x16xbf16, #tpu.memory_space<vmem>>, vector<1x32x16xbf16>
    %274 = vector.shape_cast %273 : vector<1x32x16xbf16> to vector<32x16xbf16>
    %cst_161 = arith.constant dense<0.000000e+00> : vector<16x16xf32>
    %275 = tpu.matmul %212, %274, %cst_161 {dimension_numbers = #tpu.dot_dimension_numbers<[1], [0], [0], [1], [0, 0, 1, 1], [], []>} : vector<16x32xbf16>, vector<32x16xbf16>, vector<16x16xf32> -> vector<16x16xf32>
    %c11_162 = arith.constant 11 : index
    %c0_163 = arith.constant 0 : index
    %c0_164 = arith.constant 0 : index
    %276 = vector.load %arg6[%c11_162, %c0_163, %c0_164] : memref<12x1x16xf32, #tpu.memory_space<vmem>>, vector<1x1x16xf32>
    %277 = vector.shape_cast %276 : vector<1x1x16xf32> to vector<1x16xf32>
    %278 = vector.broadcast %277 : vector<1x16xf32> to vector<16x16xf32>
    %279 = arith.addf %275, %278 : vector<16x16xf32>
    %280 = arith.truncf %265 : vector<16x16xf32> to vector<16x16xbf16>
    %281 = arith.truncf %272 : vector<16x16xf32> to vector<16x16xbf16>
    %cst_165 = arith.constant dense<0.000000e+00> : vector<16x16xf32>
    %282 = tpu.matmul %280, %281, %cst_165 {dimension_numbers = #tpu.dot_dimension_numbers<[1], [1], [0], [0], [0, 0, 1, 0], [], []>} : vector<16x16xbf16>, vector<16x16xbf16>, vector<16x16xf32> -> vector<16x16xf32>
    %cst_166 = arith.constant 2.500000e-01 : f32
    %283 = vector.broadcast %cst_166 : f32 to vector<16x16xf32>
    %284 = arith.mulf %282, %283 : vector<16x16xf32>
    %285 = arith.addf %284, %36 : vector<16x16xf32>
    %cst_167 = arith.constant dense<0xFF800000> : vector<16xf32>
    %286 = vector.multi_reduction <maximumf>, %285, %cst_167 [1] : vector<16x16xf32> to vector<16xf32>
    %287 = vector.shape_cast %286 : vector<16xf32> to vector<16x1xf32>
    %288 = vector.broadcast %287 : vector<16x1xf32> to vector<16x16xf32>
    %289 = arith.subf %285, %288 : vector<16x16xf32>
    %290 = math.exp %289 : vector<16x16xf32>
    %cst_168 = arith.constant dense<0.000000e+00> : vector<16xf32>
    %291 = vector.multi_reduction <add>, %290, %cst_168 [1] : vector<16x16xf32> to vector<16xf32>
    %292 = vector.shape_cast %291 : vector<16xf32> to vector<16x1xf32>
    %293 = tpu.reciprocal %292 {approx = true} : vector<16x1xf32> -> vector<16x1xf32>
    %294 = vector.broadcast %293 : vector<16x1xf32> to vector<16x16xf32>
    %295 = arith.mulf %290, %294 : vector<16x16xf32>
    %296 = arith.truncf %295 : vector<16x16xf32> to vector<16x16xbf16>
    %297 = arith.truncf %279 : vector<16x16xf32> to vector<16x16xbf16>
    %cst_169 = arith.constant dense<0.000000e+00> : vector<16x16xf32>
    %298 = tpu.matmul %296, %297, %cst_169 {dimension_numbers = #tpu.dot_dimension_numbers<[1], [0], [0], [1], [0, 0, 1, 1], [], []>} : vector<16x16xbf16>, vector<16x16xbf16>, vector<16x16xf32> -> vector<16x16xf32>
    %299 = arith.truncf %298 : vector<16x16xf32> to vector<16x16xbf16>
    %c3_170 = arith.constant 3 : index
    %c0_171 = arith.constant 0 : index
    %c0_172 = arith.constant 0 : index
    %300 = vector.load %arg7[%c3_170, %c0_171, %c0_172] : memref<4x16x32xbf16, #tpu.memory_space<vmem>>, vector<1x16x32xbf16>
    %301 = vector.shape_cast %300 : vector<1x16x32xbf16> to vector<16x32xbf16>
    %cst_173 = arith.constant dense<0.000000e+00> : vector<16x32xf32>
    %302 = tpu.matmul %299, %301, %cst_173 {dimension_numbers = #tpu.dot_dimension_numbers<[1], [0], [0], [1], [0, 0, 1, 1], [], []>} : vector<16x16xbf16>, vector<16x32xbf16>, vector<16x32xf32> -> vector<16x32xf32>
    %303 = arith.addf %258, %302 : vector<16x32xf32>
    %c6_174 = arith.constant 6 : index
    %c0_175 = arith.constant 0 : index
    %c0_176 = arith.constant 0 : index
    %304 = vector.load %arg8[%c6_174, %c0_175, %c0_176] : memref<12x1x32xf32, #tpu.memory_space<vmem>>, vector<1x1x32xf32>
    %305 = vector.shape_cast %304 : vector<1x1x32xf32> to vector<1x32xf32>
    %306 = vector.broadcast %305 : vector<1x32xf32> to vector<16x32xf32>
    %307 = arith.addf %303, %306 : vector<16x32xf32>
    %308 = arith.addf %307, %211 : vector<16x32xf32>
    %c7_177 = arith.constant 7 : index
    %c0_178 = arith.constant 0 : index
    %c0_179 = arith.constant 0 : index
    %309 = vector.load %arg8[%c7_177, %c0_178, %c0_179] : memref<12x1x32xf32, #tpu.memory_space<vmem>>, vector<1x1x32xf32>
    %310 = vector.shape_cast %309 : vector<1x1x32xf32> to vector<1x32xf32>
    %c8_180 = arith.constant 8 : index
    %c0_181 = arith.constant 0 : index
    %c0_182 = arith.constant 0 : index
    %311 = vector.load %arg8[%c8_180, %c0_181, %c0_182] : memref<12x1x32xf32, #tpu.memory_space<vmem>>, vector<1x1x32xf32>
    %312 = vector.shape_cast %311 : vector<1x1x32xf32> to vector<1x32xf32>
    %cst_183 = arith.constant dense<0.000000e+00> : vector<16xf32>
    %313 = vector.multi_reduction <add>, %308, %cst_183 [1] : vector<16x32xf32> to vector<16xf32>
    %314 = vector.shape_cast %313 : vector<16xf32> to vector<16x1xf32>
    %cst_184 = arith.constant 3.200000e+01 : f32
    %315 = vector.broadcast %cst_184 : f32 to vector<16x1xf32>
    %316 = arith.divf %314, %315 : vector<16x1xf32>
    %317 = vector.broadcast %316 : vector<16x1xf32> to vector<16x32xf32>
    %318 = arith.subf %308, %317 : vector<16x32xf32>
    %319 = arith.mulf %318, %318 : vector<16x32xf32>
    %cst_185 = arith.constant dense<0.000000e+00> : vector<16xf32>
    %320 = vector.multi_reduction <add>, %319, %cst_185 [1] : vector<16x32xf32> to vector<16xf32>
    %321 = vector.shape_cast %320 : vector<16xf32> to vector<16x1xf32>
    %cst_186 = arith.constant 3.200000e+01 : f32
    %322 = vector.broadcast %cst_186 : f32 to vector<16x1xf32>
    %323 = arith.divf %321, %322 : vector<16x1xf32>
    %cst_187 = arith.constant 9.99999996E-13 : f32
    %324 = vector.broadcast %cst_187 : f32 to vector<16x1xf32>
    %325 = arith.addf %323, %324 : vector<16x1xf32>
    %326 = math.rsqrt %325 : vector<16x1xf32>
    %327 = vector.broadcast %326 : vector<16x1xf32> to vector<16x32xf32>
    %328 = arith.mulf %318, %327 : vector<16x32xf32>
    %329 = vector.broadcast %310 : vector<1x32xf32> to vector<16x32xf32>
    %330 = arith.mulf %328, %329 : vector<16x32xf32>
    %331 = vector.broadcast %312 : vector<1x32xf32> to vector<16x32xf32>
    %332 = arith.addf %330, %331 : vector<16x32xf32>
    %333 = arith.truncf %332 : vector<16x32xf32> to vector<16x32xbf16>
    %c1_188 = arith.constant 1 : index
    %c0_189 = arith.constant 0 : index
    %c0_190 = arith.constant 0 : index
    %334 = vector.load %arg10[%c1_188, %c0_189, %c0_190] : memref<2x32x64xbf16, #tpu.memory_space<vmem>>, vector<1x32x64xbf16>
    %335 = vector.shape_cast %334 : vector<1x32x64xbf16> to vector<32x64xbf16>
    %cst_191 = arith.constant dense<0.000000e+00> : vector<16x64xf32>
    %336 = tpu.matmul %333, %335, %cst_191 {dimension_numbers = #tpu.dot_dimension_numbers<[1], [0], [0], [1], [0, 0, 1, 1], [], []>} : vector<16x32xbf16>, vector<32x64xbf16>, vector<16x64xf32> -> vector<16x64xf32>
    %c1_192 = arith.constant 1 : index
    %c0_193 = arith.constant 0 : index
    %c0_194 = arith.constant 0 : index
    %337 = vector.load %arg9[%c1_192, %c0_193, %c0_194] : memref<2x1x64xf32, #tpu.memory_space<vmem>>, vector<1x1x64xf32>
    %338 = vector.shape_cast %337 : vector<1x1x64xf32> to vector<1x64xf32>
    %339 = vector.broadcast %338 : vector<1x64xf32> to vector<16x64xf32>
    %340 = arith.addf %336, %339 : vector<16x64xf32>
    %cst_195 = arith.constant 5.000000e-01 : f32
    %341 = vector.broadcast %cst_195 : f32 to vector<16x64xf32>
    %342 = arith.mulf %341, %340 : vector<16x64xf32>
    %cst_196 = arith.constant 4.471500e-02 : f32
    %343 = vector.broadcast %cst_196 : f32 to vector<16x64xf32>
    %344 = arith.mulf %343, %340 : vector<16x64xf32>
    %345 = arith.mulf %344, %340 : vector<16x64xf32>
    %346 = arith.mulf %345, %340 : vector<16x64xf32>
    %347 = arith.addf %340, %346 : vector<16x64xf32>
    %cst_197 = arith.constant 0.797884583 : f32
    %348 = vector.broadcast %cst_197 : f32 to vector<16x64xf32>
    %349 = arith.mulf %348, %347 : vector<16x64xf32>
    %350 = math.tanh %349 : vector<16x64xf32>
    %cst_198 = arith.constant 1.000000e+00 : f32
    %351 = vector.broadcast %cst_198 : f32 to vector<16x64xf32>
    %352 = arith.addf %351, %350 : vector<16x64xf32>
    %353 = arith.mulf %342, %352 : vector<16x64xf32>
    %354 = arith.truncf %353 : vector<16x64xf32> to vector<16x64xbf16>
    %c1_199 = arith.constant 1 : index
    %c0_200 = arith.constant 0 : index
    %c0_201 = arith.constant 0 : index
    %355 = vector.load %arg11[%c1_199, %c0_200, %c0_201] : memref<2x64x32xbf16, #tpu.memory_space<vmem>>, vector<1x64x32xbf16>
    %356 = vector.shape_cast %355 : vector<1x64x32xbf16> to vector<64x32xbf16>
    %cst_202 = arith.constant dense<0.000000e+00> : vector<16x32xf32>
    %357 = tpu.matmul %354, %356, %cst_202 {dimension_numbers = #tpu.dot_dimension_numbers<[1], [0], [0], [1], [0, 0, 1, 1], [], []>} : vector<16x64xbf16>, vector<64x32xbf16>, vector<16x32xf32> -> vector<16x32xf32>
    %c9_203 = arith.constant 9 : index
    %c0_204 = arith.constant 0 : index
    %c0_205 = arith.constant 0 : index
    %358 = vector.load %arg8[%c9_203, %c0_204, %c0_205] : memref<12x1x32xf32, #tpu.memory_space<vmem>>, vector<1x1x32xf32>
    %359 = vector.shape_cast %358 : vector<1x1x32xf32> to vector<1x32xf32>
    %360 = vector.broadcast %359 : vector<1x32xf32> to vector<16x32xf32>
    %361 = arith.addf %357, %360 : vector<16x32xf32>
    %362 = arith.addf %361, %332 : vector<16x32xf32>
    %c10_206 = arith.constant 10 : index
    %c0_207 = arith.constant 0 : index
    %c0_208 = arith.constant 0 : index
    %363 = vector.load %arg8[%c10_206, %c0_207, %c0_208] : memref<12x1x32xf32, #tpu.memory_space<vmem>>, vector<1x1x32xf32>
    %364 = vector.shape_cast %363 : vector<1x1x32xf32> to vector<1x32xf32>
    %c11_209 = arith.constant 11 : index
    %c0_210 = arith.constant 0 : index
    %c0_211 = arith.constant 0 : index
    %365 = vector.load %arg8[%c11_209, %c0_210, %c0_211] : memref<12x1x32xf32, #tpu.memory_space<vmem>>, vector<1x1x32xf32>
    %366 = vector.shape_cast %365 : vector<1x1x32xf32> to vector<1x32xf32>
    %cst_212 = arith.constant dense<0.000000e+00> : vector<16xf32>
    %367 = vector.multi_reduction <add>, %362, %cst_212 [1] : vector<16x32xf32> to vector<16xf32>
    %368 = vector.shape_cast %367 : vector<16xf32> to vector<16x1xf32>
    %cst_213 = arith.constant 3.200000e+01 : f32
    %369 = vector.broadcast %cst_213 : f32 to vector<16x1xf32>
    %370 = arith.divf %368, %369 : vector<16x1xf32>
    %371 = vector.broadcast %370 : vector<16x1xf32> to vector<16x32xf32>
    %372 = arith.subf %362, %371 : vector<16x32xf32>
    %373 = arith.mulf %372, %372 : vector<16x32xf32>
    %cst_214 = arith.constant dense<0.000000e+00> : vector<16xf32>
    %374 = vector.multi_reduction <add>, %373, %cst_214 [1] : vector<16x32xf32> to vector<16xf32>
    %375 = vector.shape_cast %374 : vector<16xf32> to vector<16x1xf32>
    %cst_215 = arith.constant 3.200000e+01 : f32
    %376 = vector.broadcast %cst_215 : f32 to vector<16x1xf32>
    %377 = arith.divf %375, %376 : vector<16x1xf32>
    %cst_216 = arith.constant 9.99999996E-13 : f32
    %378 = vector.broadcast %cst_216 : f32 to vector<16x1xf32>
    %379 = arith.addf %377, %378 : vector<16x1xf32>
    %380 = math.rsqrt %379 : vector<16x1xf32>
    %381 = vector.broadcast %380 : vector<16x1xf32> to vector<16x32xf32>
    %382 = arith.mulf %372, %381 : vector<16x32xf32>
    %383 = vector.broadcast %364 : vector<1x32xf32> to vector<16x32xf32>
    %384 = arith.mulf %382, %383 : vector<16x32xf32>
    %385 = vector.broadcast %366 : vector<1x32xf32> to vector<16x32xf32>
    %386 = arith.addf %384, %385 : vector<16x32xf32>
    %387 = arith.truncf %386 : vector<16x32xf32> to vector<16x32xbf16>
    %c0_217 = arith.constant 0 : index
    %c0_218 = arith.constant 0 : index
    %388 = vector.load %arg12[%c0_217, %c0_218] : memref<32x128xbf16, #tpu.memory_space<vmem>>, vector<32x128xbf16>
    %cst_219 = arith.constant dense<0.000000e+00> : vector<16x128xf32>
    %389 = tpu.matmul %387, %388, %cst_219 {dimension_numbers = #tpu.dot_dimension_numbers<[1], [0], [0], [1], [0, 0, 1, 1], [], []>} : vector<16x32xbf16>, vector<32x128xbf16>, vector<16x128xf32> -> vector<16x128xf32>
    %c0_220 = arith.constant 0 : index
    %c0_221 = arith.constant 0 : index
    %390 = vector.load %arg13[%c0_220, %c0_221] : memref<1x128xf32, #tpu.memory_space<vmem>>, vector<1x128xf32>
    %391 = vector.broadcast %390 : vector<1x128xf32> to vector<16x128xf32>
    %392 = arith.addf %389, %391 : vector<16x128xf32>
    %c0_222 = arith.constant 0 : index
    %c0_223 = arith.constant 0 : index
    %393 = vector.load %arg14[%c0_222, %c0_223] : memref<16x128xf32, #tpu.memory_space<vmem>>, vector<16x128xf32>
    tpu.vector_store %arg14[%c0_222, %c0_223], %392 {strides = array<i32>} : memref<16x128xf32, #tpu.memory_space<vmem>>, vector<16x128xf32>,
    return
  }
}

</mosaic_0001>

<bundles_post_ra>
// kernel: mul.22
= control target key start
LH: loop header
LB: loop body
LE: loop exit
PB: predicated region body
PF: predicated region fallthrough
CT: control target
= control target key end

     0   :  { %vm7_vm0 = vcmask 64512   ;;  %vm13_vm1 = vcmask 130112   ;;  %s39_s0 = inlined_call_operand.vmem [shape: f32[2,8], index: 0, kind: input, shape index: {}]   ;;  %s40_s1 = inlined_call_operand.vmem [shape: f32[16], index: 1, kind: output, shape index: {}]  }
   0x1   :  { %v4_v0 = vld [vmem:[%s39_s0] sm:$0x3]  ;;  %s22_s0 = smov 8  }
   0x2   :  { %5 = vst [vmem:[#allocation1] sm:$0x3] %v4_v0 }
   0x9   :  { %v10_v1 = vld [vmem:[#allocation1 + $0x1] sm:$0x1]   ;;  %v6_v2 = vld [vmem:[#allocation1] sm:$0x1]  }
   0xa   :  { %11 = vrot.lane.b32.xlu0 %v10_v1, %s22_s0  ;;  %8 = vst.msk [vmem:[#allocation0] sm:$0x1] %vm7_vm0, %v6_v2  }
  0x7c   :  { %v12_v3 = vpop.permute.xlu0 %11  }
  0x7d   :  { %14 = vst.msk [vmem:[#allocation0] sm:$0x1] %vm13_vm1, %v12_v3  }
  0x84   :  { %v18_v4 = vld [vmem:[#allocation0] sm:$0x1] }
  0x85   :  { %20 = vst [vmem:[%s40_s1] sm:$0x1] %v18_v4 }

// kernel: bert_classifier_forward.1
= control target key start
LH: loop header
LB: loop body
LE: loop exit
PB: predicated region body
PF: predicated region fallthrough
CT: control target
= control target key end

     0   :  { %v2932_v0 = vmov 0   ;;  %v2933_v2 = vmov 0.0   ;;  %vm2934_vm0 = vmmov 0   ;;  %v50_v8 = vlaneseq  ;;  %s3504_s0 = inlined_call_operand.vmem [shape: s32[16,1], index: 0, kind: input, shape index: {}]   ;;  %s3505_s3 = inlined_call_operand.vmem [shape: bf16[64,32], index: 3, kind: input, shape index: {}]   ;;  %s3506_s2 = inlined_call_operand.vmem [shape: f32[16,32], index: 2, kind: input, shape index: {}]   ;;  %s3507_s5 = inlined_call_operand.vmem [shape: bf16[12,32,16], index: 5, kind: input, shape index: {}]   ;;  %s3508_s4 = inlined_call_operand.vmem [shape: f32[2,1,32], index: 4, kind: input, shape index: {}]   ;;  %s3509_s6 = inlined_call_operand.vmem [shape: f32[12,1,16], index: 6, kind: input, shape index: {}]   ;;  %s3510_s1 = inlined_call_operand.vmem [shape: f32[16,16], index: 1, kind: input, shape index: {}]   ;;  %s3511_s7 = inlined_call_operand.vmem [shape: bf16[4,16,32], index: 7, kind: input, shape index: {}]   ;;  %s3512_s8 = inlined_call_operand.vmem [shape: f32[12,1,32], index: 8, kind: input, shape index: {}]   ;;  %s3513_s10 = inlined_call_operand.vmem [shape: bf16[2,32,64], index: 10, kind: input, shape index: {}]   ;;  %s3514_s11 = inlined_call_operand.vmem [shape: bf16[2,64,32], index: 11, kind: input, shape index: {}]   ;;  %s3515_s9 = inlined_call_operand.vmem [shape: f32[2,1,64], index: 9, kind: input, shape index: {}]   ;;  %s3516_s12 = inlined_call_operand.vmem [shape: bf16[32,128], index: 12, kind: input, shape index: {}]   ;;  %s3517_s13 = inlined_call_operand.vmem [shape: f32[1,128], index: 13, kind: input, shape index: {}]   ;;  %s3518_s14 = inlined_call_operand.vmem [shape: f32[16,128], index: 14, kind: output, shape index: {}]  }
   0x1   :  { %2825 = vset.pattern.permute.xlu0 %v2932_v0  ;;  %v48_v1 = vld [vmem:[%s3504_s0] sm:$0xff]  ;;  %2594 = vmatprep.subr.bf16.mxu0 %v2933_v2  ;;  %v49_v4 = vld [vmem:[%s3504_s0 + $0x8] sm:$0xff]  ;;  %v2828_v6 = vld [vmem:[%s3505_s3 + $0x10] sm:$0xff]   ;;  %vm97_vm3 = vcmask 523264   ;;  %vm145_vm4 = vcmask 261120   ;;  %vm393_vm5 = vcmask 130048  }
   0x2   :  { %53 = vperm.xlu0 %2825, %v48_v1   ;;  %v2826_v3 = vld [vmem:[%s3505_s3] sm:$0xff]   ;;  %2606 = vmatprep.subr.bf16.mxu1 %v2933_v2  ;;  %v2827_v5 = vld [vmem:[%s3505_s3 + $0x8] sm:$0xff]   ;;  %v2829_v7 = vld [vmem:[%s3505_s3 + $0x18] sm:$0xff]   ;;  %v51_v9 = vand.u32 127, %v50_v8 }
   0x3   :  { %2595 = vmatpush3.bf16.msra.mxu0 %v2826_v3  ;;  %2602 = vmatprep.mubr.msk.bf16.mxu0 %vm2934_vm0, %v2933_v2  ;;  %v71_v15 = vld [vmem:[%s3506_s2] sm:$0xff]  ;;  %v72_v17 = vld [vmem:[%s3506_s2 + $0x8] sm:$0xff] }
   0x4   :  { %2596 = vmatprep.subr.bf16.mxu0 %v2933_v2  ;;  %2610 = vmatprep.mubr.msk.bf16.mxu1 %vm2934_vm0, %v2933_v2  ;;  %v2830_v35 = vld [vmem:[%s3507_s5] sm:$0xff]   ;;  %v2832_v37 = vld [vmem:[%s3507_s5 + $0x8] sm:$0xff]  }
   0x5   :  { %v2831_v36 = vld [vmem:[%s3507_s5 + $0x40] sm:$0xff]   ;;  %2607 = vmatpush3.bf16.msra.mxu1 %v2830_v35  ;;  %v2833_v38 = vld [vmem:[%s3507_s5 + $0x48] sm:$0xff]  }
   0x6   :  { %56 = vperm.xlu0 %2825, %v49_v4   ;;  %2608 = vmatprep.subr.bf16.mxu1 %v2933_v2  ;;  %v2325_v47 = vld [vmem:[%s3508_s4] ss:$0 sm:$0xff]  ;;  %v2326_v51 = vld [vmem:[%s3508_s4 + $0x1] ss:$0 sm:$0xff]  ;;  %v2835_v57 = vld [vmem:[%s3507_s5 + $0x28] sm:$0xff]  }
   0x7   :  { %2597 = vmatpush3.bf16.msra.mxu0 %v2827_v5  ;;  %v2834_v55 = vld [vmem:[%s3507_s5 + $0x20] sm:$0xff]  }
   0x8   :  { %2598 = vmatprep.subr.bf16.mxu0 %v2933_v2  ;;  %v2327_v58 = vld [vmem:[%s3509_s6] ss:$0 sm:$0xff]  ;;  %v2345_v60 = vld [vmem:[%s3509_s6 + $0x4] ss:$0 sm:$0xff]  ;;  %v2356_v35 = vld [vmem:[%s3509_s6 + $0x1] ss:$0 sm:$0xff] }
   0x9   :  { %2609 = vmatpush3.bf16.msra.mxu1 %v2832_v37 }
   0xa   :  { %2614 = vmatprep.subr.bf16.mxu1 %v2933_v2 }
   0xb   :  { %2599 = vmatpush3.bf16.msra.mxu0 %v2828_v6 }
   0xc   :  { %2600 = vmatprep.subr.bf16.mxu0 %v2933_v2 }
   0xf   :  { %2601 = vmatpush3.bf16.msra.mxu0 %v2829_v7 }
  0x10   :  { %2622 = vmatprep.subr.bf16.mxu0 %v2933_v2 }
  0x81   :  { %v54_v10 = vpop.permute.xlu0 %53 }
  0x82   :  { %vm58_vm1 = vcmp.eq.s32.totalorder %v51_v9, %v54_v10 }
  0x83   :  { %v60_v12 = vsel %vm58_vm1, 1.0, %v2933_v2 }
  0x85   :  { %v57_v11 = vpop.permute.xlu0 %56 }
  0x86   :  { %vm59_vm2 = vcmp.eq.s32.totalorder %v51_v9, %v57_v11  ;;  %v2336_v11 = vld [vmem:[%s3509_s6 + $0x2] ss:$0 sm:$0xff] }
  0x87   :  { %v61_v13 = vsel %vm59_vm2, 1.0, %v2933_v2 }
  0x88   :  { %v62_v14 = vpack.c.bf16 %v61_v13, %v60_v12 }
  0x8a   :  { %2603 = vmatmul.mubr.msk.bf16.vlgmr.msra.gmra.mrb[0].mxu0 %vm97_vm3, %v62_v14 }
  0x8b   :  { %2626 = vmatprep.mubr.msk.bf16.mxu0 %vm2934_vm0, %v2933_v2  ;;  %2623 = vmatpush3.bf16.msra.mxu0 %v2831_v36 }
  0x8c   :  { %2624 = vmatprep.subr.bf16.mxu0 %v2933_v2 }
  0x8f   :  { %2625 = vmatpush3.bf16.msra.mxu0 %v2833_v38 }
  0x90   :  { %2636 = vmatprep.subr.bf16.mxu0 %v2933_v2 }
 0x15d   :  { %v135_v16 = vpop.f32.mrb[0].mxu0 }
 0x15e   :  { %v136_v18 = vadd.f32 %v135_v16, %v71_v15  ;;  %v2604_v19 = vpop.f32.mrb[1].mxu0 }
 0x15f   :  { %v138_v20 = vpop.f32.mrb[2].mxu0 }
 0x160   :  { %v139_v21 = vadd.f32 %v138_v20, %v72_v17  ;;  %v2605_v22 = vpop.f32.mrb[3].mxu0  ;;  %v146_v23 = vsel %vm145_vm4, %v136_v18, 0.0  ;;  %v2836_v20 = vld [vmem:[%s3507_s5 + $0x10] sm:$0xff]  }
 0x161   :  { %147 = vadd.xlane.f32.xlu1 %v146_v23  ;;  %v2838_v22 = vld [vmem:[%s3507_s5 + $0x50] sm:$0xff]   ;;  %v2839_v23 = vld [vmem:[%s3507_s5 + $0x58] sm:$0xff]  }
 0x162   :  { %v149_v24 = vsel %vm145_vm4, %v139_v21, 0.0 }
 0x165   :  { %150 = vadd.xlane.f32.xlu1 %v149_v24 }
 0x1ee   :  { %v148_v25 = vpop.xlane.xlu1 %147 }
 0x1ef   :  { %v153_v26 = vmul.f32 0.03125, %v148_v25  ;;  %v3145_v25 = vld [vmem:[%s3510_s1] sm:$0xff] }
 0x1f1   :  { %v155_v27 = vsub.f32 %v136_v18, %v153_v26 }
 0x1f2   :  { %v151_v28 = vpop.xlane.xlu1 %150 }
 0x1f3   :  { %v154_v29 = vmul.f32 0.03125, %v151_v28  ;;  %v157_v30 = vmul.f32 %v155_v27, %v155_v27 }
 0x1f5   :  { %v156_v31 = vsub.f32 %v139_v21, %v154_v29  ;;  %v159_v32 = vsel %vm145_vm4, %v157_v30, 0.0  ;;  %v2837_v21 = vld [vmem:[%s3507_s5 + $0x18] sm:$0xff]   ;;  %v3150_v29 = vld [vmem:[%s3510_s1 + $0x8] sm:$0xff] }
 0x1f6   :  { %160 = vadd.xlane.f32.xlu0 %v159_v32 }
 0x1f7   :  { %v158_v33 = vmul.f32 %v156_v31, %v156_v31 }
 0x1f9   :  { %v162_v34 = vsel %vm145_vm4, %v158_v33, 0.0 }
 0x1fa   :  { %163 = vadd.xlane.f32.xlu1 %v162_v34 }
 0x283   :  { %v161_v39 = vpop.xlane.xlu0 %160 }
 0x284   :  { %v165_v40 = vmul.f32 0.03125, %v161_v39 }
 0x286   :  { %v167_v41 = vadd.f32 1e-12, %v165_v40 }
 0x287   :  { %v164_v42 = vpop.xlane.xlu1 %163 }
 0x288   :  { %2872 = vrsqrt.f32 %v167_v41  ;;  %v166_v43 = vmul.f32 0.03125, %v164_v42 }
 0x28a   :  { %v168_v44 = vadd.f32 1e-12, %v166_v43 }
 0x28c   :  { %2874 = vrsqrt.f32 %v168_v44  ;;  %v2374_v44 = vld [vmem:[%s3509_s6 + $0x5] ss:$0 sm:$0xff] }
 0x292   :  { %v2873_v45 = vpop.eup %2872 }
 0x293   :  { %v171_v46 = vmul.f32 %v2873_v45, %v155_v27 }
 0x295   :  { %v179_v49 = vmul.f32 %v2325_v47, %v171_v46 }
 0x296   :  { %v2875_v48 = vpop.eup %2874 }
 0x297   :  { %v172_v50 = vmul.f32 %v2875_v48, %v156_v31  ;;  %v3075_v53 = vadd.f32 %v2326_v51, %v179_v49 }
 0x299   :  { %v180_v52 = vmul.f32 %v2325_v47, %v172_v50 }
 0x29b   :  { %v3077_v54 = vadd.f32 %v2326_v51, %v180_v52 }
 0x29d   :  { %v3084_v56 = vpack.c.bf16 %v3077_v54, %v3075_v53 }
 0x29f   :  { %2611 = vmatmul.mubr.msk.bf16.vlgmr.msra.gmra.mrb[0].mxu1 %vm145_vm4, %v3084_v56  ;;  %2627 = vmatmul.mubr.msk.bf16.vlgmr.msra.gmra.mrb[4].mxu0 %vm145_vm4, %v3084_v56 }
 0x2a0   :  { %2615 = vmatpush3.bf16.msra.mxu1 %v2834_v55  ;;  %2618 = vmatprep.mubr.msk.bf16.mxu1 %vm2934_vm0, %v2933_v2 }
 0x2a1   :  { %2616 = vmatprep.subr.bf16.mxu1 %v2933_v2  ;;  %2638 = vmatprep.mubr.msk.bf16.mxu0 %vm2934_vm0, %v2933_v2 }
 0x2a4   :  { %2617 = vmatpush3.bf16.msra.mxu1 %v2835_v57 }
 0x2a5   :  { %2630 = vmatprep.subr.bf16.mxu1 %v2933_v2 }
 0x2a7   :  { %2619 = vmatmul.mubr.msk.bf16.vlgmr.msra.gmra.mrb[4].mxu1 %vm145_vm4, %v3084_v56 }
 0x2a8   :  { %2632 = vmatprep.mubr.msk.bf16.mxu1 %vm2934_vm0, %v2933_v2 }
 0x372   :  { %v252_v59 = vpop.f32.mrb[0].mxu1  ;;  %v384_v61 = vpop.f32.mrb[4].mxu0 }
 0x373   :  { %v2612_v62 = vpop.f32.mrb[1].mxu1  ;;  %v2628_v63 = vpop.f32.mrb[5].mxu0  ;;  %v253_v3 = vadd.f32 %v2327_v58, %v252_v59  ;;  %v385_v4 = vadd.f32 %v2345_v60, %v384_v61 }
 0x374   :  { %v255_v0 = vpop.f32.mrb[2].mxu1  ;;  %v387_v1 = vpop.f32.mrb[6].mxu0 }
 0x375   :  { %v256_v5 = vadd.f32 %v2327_v58, %v255_v0  ;;  %v388_v6 = vadd.f32 %v2345_v60, %v387_v1  ;;  %v2613_v7 = vpop.f32.mrb[3].mxu1  ;;  %v2629_v8 = vpop.f32.mrb[7].mxu0 }
 0x376   :  { %v2840_v8 = vld [vmem:[%s3507_s5 + $0x30] sm:$0xff]  }
 0x377   :  { %v391_v9 = vpack.c.bf16 %v256_v5, %v253_v3  ;;  %v468_v10 = vpack.c.bf16 %v388_v6, %v385_v4 }
 0x379   :  { %2637 = vmatpush3.bf16.msra.mxu0 %v468_v10  ;;  %v2841_v10 = vld [vmem:[%s3507_s5 + $0x38] sm:$0xff]  }
 0x37a   :  { %v318_v12 = vpop.f32.mrb[4].mxu1  ;;  %2650 = vmatprep.subr.bf16.mxu0 %v2933_v2 }
 0x37b   :  { %v2620_v13 = vpop.f32.mrb[5].mxu1  ;;  %v319_v15 = vadd.f32 %v2336_v11, %v318_v12 }
 0x37c   :  { %v321_v14 = vpop.f32.mrb[6].mxu1 }
 0x37d   :  { %v322_v16 = vadd.f32 %v2336_v11, %v321_v14  ;;  %v2621_v17 = vpop.f32.mrb[7].mxu1 }
 0x37f   :  { %v392_v18 = vpack.c.bf16 %v322_v16, %v319_v15  ;;  %v2365_v16 = vld [vmem:[%s3509_s6 + $0x3] ss:$0 sm:$0xff] }
 0x381   :  { %v398_v19 = vsel %vm393_vm5, %v392_v18, 0 }
 0x382   :  { %2631 = vmatpush3.bf16.xpose.msra.mxu1 %v398_v19 }
 0x383   :  { %2642 = vmatprep.subr.bf16.mxu1 %v2933_v2 }
 0x389   :  { %2633 = vmatmul.mubr.msk.bf16.vlgmr.msra.gmra.mrb[8].mxu1 %vm393_vm5, %v391_v9 }
 0x38a   :  { %2643 = vmatpush3.bf16.msra.mxu1 %v2836_v20  ;;  %2646 = vmatprep.mubr.msk.bf16.mxu1 %vm2934_vm0, %v2933_v2 }
 0x38b   :  { %2644 = vmatprep.subr.bf16.mxu1 %v2933_v2 }
 0x38e   :  { %2645 = vmatpush3.bf16.msra.mxu1 %v2837_v21 }
 0x38f   :  { %2658 = vmatprep.subr.bf16.mxu1 %v2933_v2 }
 0x391   :  { %2647 = vmatmul.mubr.msk.bf16.vlgmr.msra.gmra.mrb[12].mxu1 %vm145_vm4, %v3084_v56 }
 0x392   :  { %2659 = vmatpush3.bf16.msra.mxu1 %v2838_v22  ;;  %2662 = vmatprep.mubr.msk.bf16.mxu1 %vm2934_vm0, %v2933_v2 }
 0x393   :  { %2660 = vmatprep.subr.bf16.mxu1 %v2933_v2 }
 0x396   :  { %2661 = vmatpush3.bf16.msra.mxu1 %v2839_v23 }
 0x397   :  { %2672 = vmatprep.subr.bf16.mxu1 %v2933_v2 }
 0x399   :  { %2663 = vmatmul.mubr.msk.bf16.vlgmr.msra.gmra.mrb[16].mxu1 %vm145_vm4, %v3084_v56 }
 0x39a   :  { %2674 = vmatprep.mubr.msk.bf16.mxu1 %vm2934_vm0, %v2933_v2 }
 0x45c   :  { %v434_v24 = vpop.f32.mrb[8].mxu1 }
 0x45d   :  { %v441_v26 = vmul.f32 0.25, %v434_v24  ;;  %v2634_v27 = vpop.f32.mrb[9].mxu1 }
 0x45e   :  { %v437_v28 = vpop.f32.mrb[10].mxu1 }
 0x45f   :  { %v442_v30 = vmul.f32 0.25, %v437_v28  ;;  %v2635_v31 = vpop.f32.mrb[11].mxu1  ;;  %v443_v32 = vadd.f32 %v441_v26, %v3145_v25 }
 0x461   :  { %v445_v33 = vsel %vm393_vm5, %v443_v32, -inf  ;;  %v444_v34 = vadd.f32 %v442_v30, %v3150_v29 }
 0x462   :  { %446 = vmax.xlane.f32.xlu1 %v445_v33 }
 0x463   :  { %v448_v38 = vsel %vm393_vm5, %v444_v34, -inf }
 0x464   :  { %v575_v36 = vpop.f32.mrb[12].mxu1 }
 0x465   :  { %v2648_v37 = vpop.f32.mrb[13].mxu1  ;;  %v3159_v40 = vadd.f32 %v2356_v35, %v575_v36 }
 0x466   :  { %449 = vmax.xlane.f32.xlu1 %v448_v38  ;;  %v578_v39 = vpop.f32.mrb[14].mxu1 }
 0x467   :  { %v3161_v41 = vadd.f32 %v2356_v35, %v578_v39  ;;  %v2649_v42 = vpop.f32.mrb[15].mxu1 }
 0x469   :  { %v714_v43 = vpack.c.bf16 %v3161_v41, %v3159_v40 }
 0x46c   :  { %v707_v45 = vpop.f32.mrb[16].mxu1 }
 0x46d   :  { %v2664_v46 = vpop.f32.mrb[17].mxu1  ;;  %v708_v48 = vadd.f32 %v2374_v44, %v707_v45 }
 0x46e   :  { %v710_v47 = vpop.f32.mrb[18].mxu1  ;;  %v2843_v46 = vld [vmem:[%s3511_s7 + $0x8] sm:$0xff]  }
 0x46f   :  { %v711_v49 = vadd.f32 %v2374_v44, %v710_v47  ;;  %v2665_v50 = vpop.f32.mrb[19].mxu1 }
 0x471   :  { %v790_v51 = vpack.c.bf16 %v711_v49, %v708_v48 }
 0x473   :  { %2673 = vmatpush3.bf16.msra.mxu1 %v790_v51 }
 0x474   :  { %2684 = vmatprep.subr.bf16.mxu1 %v2933_v2 }
 0x4ef   :  { %v447_v52 = vpop.xlane.xlu1 %446 }
 0x4f0   :  { %v451_v55 = vsub.f32 %v443_v32, %v447_v52 }
 0x4f2   :  { %v453_v57 = vmul.f32 1.442695, %v451_v55  ;;  %v2842_v55 = vld [vmem:[%s3511_s7] sm:$0xff]  }
 0x4f3   :  { %v450_v58 = vpop.xlane.xlu1 %449 }
 0x4f4   :  { %2876 = vpow2.f32 %v453_v57  ;;  %v452_v59 = vsub.f32 %v444_v34, %v450_v58 }
 0x4f6   :  { %v455_v60 = vmul.f32 1.442695, %v452_v59 }
 0x4f8   :  { %2878 = vpow2.f32 %v455_v60 }
 0x4fe   :  { %v2877_v61 = vpop.eup %2876 }
 0x4ff   :  { %v457_v62 = vsel %vm393_vm5, %v2877_v61, 0.0 }
 0x500   :  { %458 = vadd.xlane.f32.xlu1 %v457_v62 }
 0x502   :  { %v2879_v63 = vpop.eup %2878 }
 0x503   :  { %v460_v0 = vsel %vm393_vm5, %v2879_v63, 0.0 }
 0x504   :  { %461 = vadd.xlane.f32.xlu1 %v460_v0 }
 0x58d   :  { %v459_v1 = vpop.xlane.xlu1 %458 }
 0x58e   :  { %2880 = vrcp.f32 %v459_v1 }
 0x591   :  { %v462_v3 = vpop.xlane.xlu1 %461 }
 0x592   :  { %2882 = vrcp.f32 %v462_v3 }
 0x598   :  { %v2881_v4 = vpop.eup %2880 }
 0x599   :  { %v465_v6 = vmul.f32 %v2881_v4, %v2877_v61 }
 0x59c   :  { %v2883_v5 = vpop.eup %2882 }
 0x59d   :  { %v466_v7 = vmul.f32 %v2883_v5, %v2879_v63  ;;  %v2386_v5 = vld [vmem:[%s3512_s8] ss:$0 sm:$0xff] }
 0x59f   :  { %v467_v9 = vpack.c.bf16 %v466_v7, %v465_v6 }
 0x5a1   :  { %2639 = vmatmul.mubr.msk.bf16.vlgmr.msra.gmra.mrb[8].mxu0 %vm393_vm5, %v467_v9 }
 0x5a2   :  { %2651 = vmatpush3.bf16.msra.mxu0 %v2840_v8  ;;  %2654 = vmatprep.mubr.msk.bf16.mxu0 %vm2934_vm0, %v2933_v2 }
 0x5a3   :  { %2652 = vmatprep.subr.bf16.mxu0 %v2933_v2 }
 0x5a6   :  { %2653 = vmatpush3.bf16.msra.mxu0 %v2841_v10 }
 0x5a7   :  { %2666 = vmatprep.subr.bf16.mxu0 %v2933_v2 }
 0x5a9   :  { %2655 = vmatmul.mubr.msk.bf16.vlgmr.msra.gmra.mrb[12].mxu0 %vm145_vm4, %v3084_v56 }
 0x5aa   :  { %2668 = vmatprep.mubr.msk.bf16.mxu0 %vm2934_vm0, %v2933_v2 }
 0x674   :  { %v3186_v11 = vpop.f32.mrb[8].mxu0 }
 0x675   :  { %v2640_v12 = vpop.f32.mrb[9].mxu0 }
 0x676   :  { %v509_v13 = vpop.f32.mrb[10].mxu0 }
 0x677   :  { %v513_v14 = vpack.c.bf16 %v509_v13, %v3186_v11  ;;  %v2641_v15 = vpop.f32.mrb[11].mxu0 }
 0x67c   :  { %v641_v17 = vpop.f32.mrb[12].mxu0 }
 0x67d   :  { %v2656_v18 = vpop.f32.mrb[13].mxu0  ;;  %v642_v20 = vadd.f32 %v2365_v16, %v641_v17 }
 0x67e   :  { %v644_v19 = vpop.f32.mrb[14].mxu0 }
 0x67f   :  { %v645_v21 = vadd.f32 %v2365_v16, %v644_v19  ;;  %v2657_v56 = vpop.f32.mrb[15].mxu0 }
 0x681   :  { %v715_v22 = vpack.c.bf16 %v645_v21, %v642_v20 }
 0x683   :  { %v720_v23 = vsel %vm393_vm5, %v715_v22, 0 }
 0x684   :  { %2667 = vmatpush3.bf16.xpose.msra.mxu0 %v720_v23 }
 0x685   :  { %2678 = vmatprep.subr.bf16.mxu0 %v2933_v2 }
 0x68b   :  { %2669 = vmatmul.mubr.msk.bf16.vlgmr.msra.gmra.mrb[16].mxu0 %vm393_vm5, %v714_v43 }
 0x68c   :  { %2680 = vmatprep.mubr.msk.bf16.mxu0 %vm2934_vm0, %v2933_v2  ;;  %2679 = vmatpush3.bf16.msra.mxu0 %v2843_v46  ;;  %v2847_v46 = vld [vmem:[%s3514_s11 + $0x8] sm:$0xff]  }
 0x68d   :  { %2690 = vmatprep.subr.bf16.mxu0 %v2933_v2 }
 0x75e   :  { %v756_v24 = vpop.f32.mrb[16].mxu0 }
 0x75f   :  { %v763_v26 = vmul.f32 0.25, %v756_v24  ;;  %v2670_v27 = vpop.f32.mrb[17].mxu0 }
 0x760   :  { %v759_v28 = vpop.f32.mrb[18].mxu0 }
 0x761   :  { %v764_v30 = vmul.f32 0.25, %v759_v28  ;;  %v2671_v31 = vpop.f32.mrb[19].mxu0  ;;  %v765_v32 = vadd.f32 %v763_v26, %v3145_v25  ;;  %v2845_v26 = vld [vmem:[%s3513_s10 + $0x8] sm:$0xff]  }
 0x763   :  { %v767_v33 = vsel %vm393_vm5, %v765_v32, -inf  ;;  %v766_v34 = vadd.f32 %v764_v30, %v3150_v29 }
 0x764   :  { %768 = vmax.xlane.f32.xlu1 %v767_v33 }
 0x765   :  { %v770_v35 = vsel %vm393_vm5, %v766_v34, -inf }
 0x768   :  { %771 = vmax.xlane.f32.xlu1 %v770_v35  ;;  %v2389_v35 = vld [vmem:[%s3512_s8 + $0x1] ss:$0 sm:$0xff] }
 0x7f1   :  { %v769_v36 = vpop.xlane.xlu1 %768 }
 0x7f2   :  { %v773_v37 = vsub.f32 %v765_v32, %v769_v36 }
 0x7f4   :  { %v775_v38 = vmul.f32 1.442695, %v773_v37 }
 0x7f5   :  { %v772_v39 = vpop.xlane.xlu1 %771 }
 0x7f6   :  { %2884 = vpow2.f32 %v775_v38  ;;  %v774_v40 = vsub.f32 %v766_v34, %v772_v39 }
 0x7f8   :  { %v777_v41 = vmul.f32 1.442695, %v774_v40  ;;  %v2390_v40 = vld [vmem:[%s3512_s8 + $0x2] ss:$0 sm:$0xff] }
 0x7fa   :  { %2886 = vpow2.f32 %v777_v41 }
 0x800   :  { %v2885_v42 = vpop.eup %2884 }
 0x801   :  { %v779_v43 = vsel %vm393_vm5, %v2885_v42, 0.0 }
 0x802   :  { %780 = vadd.xlane.f32.xlu1 %v779_v43 }
 0x804   :  { %v2887_v44 = vpop.eup %2886 }
 0x805   :  { %v782_v45 = vsel %vm393_vm5, %v2887_v44, 0.0 }
 0x806   :  { %783 = vadd.xlane.f32.xlu0 %v782_v45  ;;  %v2846_v45 = vld [vmem:[%s3514_s11] sm:$0xff]  }
 0x88f   :  { %v781_v47 = vpop.xlane.xlu1 %780 }
 0x890   :  { %2888 = vrcp.f32 %v781_v47  ;;  %v2848_v47 = vld [vmem:[%s3514_s11 + $0x10] sm:$0xff]  }
 0x893   :  { %v784_v48 = vpop.xlane.xlu0 %783 }
 0x894   :  { %2890 = vrcp.f32 %v784_v48  ;;  %v2849_v48 = vld [vmem:[%s3514_s11 + $0x18] sm:$0xff]  }
 0x89a   :  { %v2889_v49 = vpop.eup %2888 }
 0x89b   :  { %v787_v51 = vmul.f32 %v2889_v49, %v2885_v42  ;;  %v2391_v49 = vld [vmem:[%s3515_s9] ss:$0 sm:$0xff] }
 0x89e   :  { %v2891_v50 = vpop.eup %2890 }
 0x89f   :  { %v788_v52 = vmul.f32 %v2891_v50, %v2887_v44 }
 0x8a1   :  { %v789_v57 = vpack.c.bf16 %v788_v52, %v787_v51 }
 0x8a3   :  { %2675 = vmatmul.mubr.msk.bf16.vlgmr.msra.gmra.mrb[20].mxu1 %vm393_vm5, %v789_v57 }
 0x8a4   :  { %2685 = vmatpush3.bf16.msra.mxu1 %v2842_v55  ;;  %2686 = vmatprep.mubr.msk.bf16.mxu1 %vm2934_vm0, %v2933_v2 }
 0x8a5   :  { %2698 = vmatprep.subr.bf16.mxu1 %v2933_v2 }
 0x8ab   :  { %2687 = vmatmul.mubr.msk.bf16.vlgmr.msra.gmra.mrb[24].mxu1 %vm393_vm5, %v513_v14 }
 0x8ac   :  { %2706 = vmatprep.mubr.msk.bf16.mxu1 %vm2934_vm0, %v2933_v2  ;;  %2699 = vmatpush3.bf16.msra.mxu1 %v2846_v45 }
 0x8ad   :  { %2700 = vmatprep.subr.bf16.mxu1 %v2933_v2 }
 0x8b0   :  { %2701 = vmatpush3.bf16.msra.mxu1 %v2847_v46  ;;  %v2404_v46 = vld [vmem:[%s3512_s8 + $0x4] ss:$0 sm:$0xff] }
 0x8b1   :  { %2702 = vmatprep.subr.bf16.mxu1 %v2933_v2 }
 0x8b4   :  { %2703 = vmatpush3.bf16.msra.mxu1 %v2848_v47 }
 0x8b5   :  { %2704 = vmatprep.subr.bf16.mxu1 %v2933_v2 }
 0x8b8   :  { %2705 = vmatpush3.bf16.msra.mxu1 %v2849_v48 }
 0x8b9   :  { %2726 = vmatprep.subr.bf16.mxu1 %v2933_v2 }
 0x976   :  { %v828_v58 = vpop.f32.mrb[20].mxu1 }
 0x977   :  { %v2676_v59 = vpop.f32.mrb[21].mxu1 }
 0x978   :  { %v831_v60 = vpop.f32.mrb[22].mxu1 }
 0x979   :  { %v835_v61 = vpack.c.bf16 %v831_v60, %v828_v58  ;;  %v2677_v62 = vpop.f32.mrb[23].mxu1 }
 0x97b   :  { %2681 = vmatmul.mubr.msk.bf16.vlgmr.msra.gmra.mrb[20].mxu0 %vm393_vm5, %v835_v61 }
 0x97c   :  { %2694 = vmatprep.mubr.msk.bf16.mxu0 %vm2934_vm0, %v2933_v2 }
 0x97e   :  { %v932_v63 = vpop.f32.mrb[24].mxu1 }
 0x97f   :  { %v2688_v0 = vpop.f32.mrb[25].mxu1 }
 0x980   :  { %v935_v1 = vpop.f32.mrb[26].mxu1 }
 0x981   :  { %v2689_v3 = vpop.f32.mrb[27].mxu1 }
 0xa4e   :  { %v882_v4 = vpop.f32.mrb[20].mxu0 }
 0xa4f   :  { %v933_v6 = vadd.f32 %v932_v63, %v882_v4  ;;  %v2682_v7 = vpop.f32.mrb[21].mxu0 }
 0xa50   :  { %v885_v8 = vpop.f32.mrb[22].mxu0 }
 0xa51   :  { %v946_v9 = vadd.f32 %v2386_v5, %v933_v6  ;;  %v936_v10 = vadd.f32 %v935_v1, %v885_v8  ;;  %v2683_v11 = vpop.f32.mrb[23].mxu0 }
 0xa53   :  { %v947_v12 = vadd.f32 %v2386_v5, %v936_v10  ;;  %v948_v13 = vadd.f32 %v946_v9, %v3075_v53 }
 0xa55   :  { %v954_v14 = vsel %vm145_vm4, %v948_v13, 0.0  ;;  %v949_v15 = vadd.f32 %v947_v12, %v3077_v54  ;;  %v2844_v54 = vld [vmem:[%s3513_s10] sm:$0xff]  }
 0xa56   :  { %955 = vadd.xlane.f32.xlu1 %v954_v14  ;;  %2691 = vmatpush3.bf16.msra.mxu0 %v2844_v54 }
 0xa57   :  { %v957_v16 = vsel %vm145_vm4, %v949_v15, 0.0  ;;  %2692 = vmatprep.subr.bf16.mxu0 %v2933_v2 }
 0xa58   :  { %958 = vadd.xlane.f32.xlu0 %v957_v16 }
 0xa5a   :  { %2693 = vmatpush3.bf16.msra.mxu0 %v2845_v26 }
 0xa5b   :  { %2710 = vmatprep.subr.bf16.mxu0 %v2933_v2 }
 0xae3   :  { %v956_v17 = vpop.xlane.xlu1 %955 }
 0xae4   :  { %v960_v18 = vmul.f32 0.03125, %v956_v17 }
 0xae5   :  { %v959_v19 = vpop.xlane.xlu0 %958 }
 0xae6   :  { %v962_v20 = vsub.f32 %v948_v13, %v960_v18  ;;  %v961_v21 = vmul.f32 0.03125, %v959_v19 }
 0xae8   :  { %v963_v56 = vsub.f32 %v949_v15, %v961_v21  ;;  %v964_v22 = vmul.f32 %v962_v20, %v962_v20  ;;  %v2396_v15 = vld [vmem:[%s3512_s8 + $0x3] ss:$0 sm:$0xff] }
 0xaea   :  { %v966_v23 = vsel %vm145_vm4, %v964_v22, 0.0  ;;  %v965_v24 = vmul.f32 %v963_v56, %v963_v56 }
 0xaeb   :  { %967 = vadd.xlane.f32.xlu1 %v966_v23 }
 0xaec   :  { %v969_v53 = vsel %vm145_vm4, %v965_v24, 0.0 }
 0xaed   :  { %970 = vadd.xlane.f32.xlu0 %v969_v53 }
 0xb78   :  { %v968_v27 = vpop.xlane.xlu1 %967 }
 0xb79   :  { %v972_v28 = vmul.f32 0.03125, %v968_v27 }
 0xb7a   :  { %v971_v30 = vpop.xlane.xlu0 %970 }
 0xb7b   :  { %v974_v31 = vadd.f32 1e-12, %v972_v28  ;;  %v973_v32 = vmul.f32 0.03125, %v971_v30 }
 0xb7d   :  { %2892 = vrsqrt.f32 %v974_v31  ;;  %v975_v33 = vadd.f32 1e-12, %v973_v32 }
 0xb7f   :  { %2894 = vrsqrt.f32 %v975_v33 }
 0xb87   :  { %v2893_v34 = vpop.eup %2892 }
 0xb88   :  { %v978_v36 = vmul.f32 %v2893_v34, %v962_v20 }
 0xb89   :  { %v2895_v37 = vpop.eup %2894 }
 0xb8a   :  { %v986_v38 = vmul.f32 %v2389_v35, %v978_v36  ;;  %v979_v39 = vmul.f32 %v2895_v37, %v963_v56  ;;  %v2851_v36 = vld [vmem:[%s3507_s5 + $0xa0] sm:$0xff]   ;;  %v2852_v37 = vld [vmem:[%s3507_s5 + $0x68] sm:$0xff]  }
 0xb8c   :  { %v987_v41 = vmul.f32 %v2389_v35, %v979_v39  ;;  %v994_v42 = vadd.f32 %v2390_v40, %v986_v38  ;;  %v2850_v35 = vld [vmem:[%s3507_s5 + $0x60] sm:$0xff]   ;;  %v2853_v38 = vld [vmem:[%s3507_s5 + $0xa8] sm:$0xff]  }
 0xb8e   :  { %v995_v43 = vadd.f32 %v2390_v40, %v987_v41 }
 0xb90   :  { %v996_v44 = vpack.c.bf16 %v995_v43, %v994_v42 }
 0xb92   :  { %2695 = vmatmul.mubr.msk.bf16.vlgmr.msra.gmra.mrb[24].mxu0 %vm145_vm4, %v996_v44 }
 0xb93   :  { %2714 = vmatprep.mubr.msk.bf16.mxu0 %vm2934_vm0, %v2933_v2  ;;  %2711 = vmatpush3.bf16.msra.mxu0 %v2850_v35 }
 0xb94   :  { %2712 = vmatprep.subr.bf16.mxu0 %v2933_v2 }
 0xb97   :  { %2713 = vmatpush3.bf16.msra.mxu0 %v2852_v37 }
 0xb98   :  { %2718 = vmatprep.subr.bf16.mxu0 %v2933_v2 }
 0xc65   :  { %v1057_v50 = vpop.f32.mrb[24].mxu0 }
 0xc66   :  { %v1058_v51 = vadd.f32 %v2391_v49, %v1057_v50  ;;  %v2696_v52 = vpop.f32.mrb[25].mxu0 }
 0xc67   :  { %v1060_v55 = vpop.f32.mrb[26].mxu0 }
 0xc68   :  { %v1066_v57 = vmul.f32 0.044715, %v1058_v51  ;;  %v1061_v58 = vadd.f32 %v2391_v49, %v1060_v55  ;;  %v2697_v59 = vpop.f32.mrb[27].mxu0  ;;  %v1064_v9 = vmul.f32 0.5, %v1058_v51 }
 0xc6a   :  { %v1068_v60 = vmul.f32 %v1066_v57, %v1058_v51  ;;  %v1067_v61 = vmul.f32 0.044715, %v1061_v58  ;;  %v1065_v10 = vmul.f32 0.5, %v1061_v58 }
 0xc6c   :  { %v1070_v62 = vmul.f32 %v1068_v60, %v1058_v51  ;;  %v1069_v63 = vmul.f32 %v1067_v61, %v1061_v58  ;;  %v2855_v60 = vld [vmem:[%s3507_s5 + $0x88] sm:$0xff]   ;;  %v2411_v61 = vld [vmem:[%s3509_s6 + $0x6] ss:$0 sm:$0xff] }
 0xc6e   :  { %v1072_v0 = vadd.f32 %v1070_v62, %v1058_v51  ;;  %v1071_v1 = vmul.f32 %v1069_v63, %v1061_v58  ;;  %v2405_v51 = vld [vmem:[%s3512_s8 + $0x5] ss:$0 sm:$0xff]  ;;  %v2429_v63 = vld [vmem:[%s3509_s6 + $0xa] ss:$0 sm:$0xff] }
 0xc70   :  { %v1074_v3 = vmul.f32 0.7978846, %v1072_v0  ;;  %v1073_v4 = vadd.f32 %v1071_v1, %v1061_v58  ;;  %v2854_v58 = vld [vmem:[%s3507_s5 + $0x80] sm:$0xff]  }
 0xc72   :  { %2896 = vtanh.f32 %v1074_v3  ;;  %v1075_v5 = vmul.f32 0.7978846, %v1073_v4 }
 0xc74   :  { %2898 = vtanh.f32 %v1075_v5 }
 0xc7c   :  { %v2897_v6 = vpop.eup %2896 }
 0xc7d   :  { %v1078_v7 = vadd.f32 1.0, %v2897_v6 }
 0xc7e   :  { %v2899_v8 = vpop.eup %2898 }
 0xc7f   :  { %v1079_v11 = vadd.f32 1.0, %v2899_v8  ;;  %v1080_v12 = vmul.f32 %v1078_v7, %v1064_v9 }
 0xc81   :  { %v1081_v13 = vmul.f32 %v1079_v11, %v1065_v10 }
 0xc83   :  { %v1082_v14 = vpack.c.bf16 %v1081_v13, %v1080_v12 }
 0xc85   :  { %2707 = vmatmul.mubr.msk.bf16.vlgmr.msra.gmra.mrb[28].mxu1 %vm97_vm3, %v1082_v14  ;;  %v2420_v14 = vld [vmem:[%s3509_s6 + $0x8] ss:$0 sm:$0xff] }
 0xc86   :  { %2730 = vmatprep.mubr.msk.bf16.mxu1 %vm2934_vm0, %v2933_v2  ;;  %2727 = vmatpush3.bf16.msra.mxu1 %v2851_v36  ;;  %v2442_v36 = vld [vmem:[%s3509_s6 + $0x7] ss:$0 sm:$0xff] }
 0xc87   :  { %2728 = vmatprep.subr.bf16.mxu1 %v2933_v2 }
 0xc8a   :  { %2729 = vmatpush3.bf16.msra.mxu1 %v2853_v38 }
 0xc8b   :  { %2740 = vmatprep.subr.bf16.mxu1 %v2933_v2 }
 0xd58   :  { %v1160_v16 = vpop.f32.mrb[28].mxu1 }
 0xd59   :  { %v1161_v17 = vadd.f32 %v2396_v15, %v1160_v16  ;;  %v2708_v18 = vpop.f32.mrb[29].mxu1 }
 0xd5a   :  { %v1163_v19 = vpop.f32.mrb[30].mxu1 }
 0xd5b   :  { %v1164_v20 = vadd.f32 %v2396_v15, %v1163_v19  ;;  %v2709_v21 = vpop.f32.mrb[31].mxu1  ;;  %v1167_v56 = vadd.f32 %v1161_v17, %v994_v42 }
 0xd5d   :  { %v1173_v22 = vsel %vm145_vm4, %v1167_v56, 0.0  ;;  %v1168_v23 = vadd.f32 %v1164_v20, %v995_v43 }
 0xd5e   :  { %1174 = vadd.xlane.f32.xlu1 %v1173_v22  ;;  %v2856_v22 = vld [vmem:[%s3507_s5 + $0x70] sm:$0xff]  }
 0xd5f   :  { %v1176_v24 = vsel %vm145_vm4, %v1168_v23, 0.0 }
 0xd60   :  { %1177 = vadd.xlane.f32.xlu0 %v1176_v24  ;;  %v2858_v24 = vld [vmem:[%s3507_s5 + $0xb0] sm:$0xff]  }
 0xdeb   :  { %v1175_v53 = vpop.xlane.xlu1 %1174 }
 0xdec   :  { %v1179_v54 = vmul.f32 0.03125, %v1175_v53  ;;  %v2859_v53 = vld [vmem:[%s3507_s5 + $0xb8] sm:$0xff]  }
 0xded   :  { %v1178_v26 = vpop.xlane.xlu0 %1177 }
 0xdee   :  { %v1181_v27 = vsub.f32 %v1167_v56, %v1179_v54  ;;  %v1180_v28 = vmul.f32 0.03125, %v1178_v26 }
 0xdf0   :  { %v1182_v30 = vsub.f32 %v1168_v23, %v1180_v28  ;;  %v1183_v31 = vmul.f32 %v1181_v27, %v1181_v27  ;;  %v2857_v23 = vld [vmem:[%s3507_s5 + $0x78] sm:$0xff]  }
 0xdf2   :  { %v1185_v32 = vsel %vm145_vm4, %v1183_v31, 0.0  ;;  %v1184_v33 = vmul.f32 %v1182_v30, %v1182_v30 }
 0xdf3   :  { %1186 = vadd.xlane.f32.xlu1 %v1185_v32 }
 0xdf4   :  { %v1188_v34 = vsel %vm145_vm4, %v1184_v33, 0.0 }
 0xdf5   :  { %1189 = vadd.xlane.f32.xlu0 %v1188_v34 }
 0xe80   :  { %v1187_v39 = vpop.xlane.xlu1 %1186 }
 0xe81   :  { %v1191_v40 = vmul.f32 0.03125, %v1187_v39 }
 0xe82   :  { %v1190_v41 = vpop.xlane.xlu0 %1189 }
 0xe83   :  { %v1193_v42 = vadd.f32 1e-12, %v1191_v40  ;;  %v1192_v43 = vmul.f32 0.03125, %v1190_v41 }
 0xe85   :  { %2900 = vrsqrt.f32 %v1193_v42  ;;  %v1194_v44 = vadd.f32 1e-12, %v1192_v43 }
 0xe87   :  { %2902 = vrsqrt.f32 %v1194_v44  ;;  %v2460_v44 = vld [vmem:[%s3509_s6 + $0xb] ss:$0 sm:$0xff] }
 0xe8f   :  { %v2901_v45 = vpop.eup %2900 }
 0xe90   :  { %v1197_v47 = vmul.f32 %v2901_v45, %v1181_v27 }
 0xe91   :  { %v2903_v48 = vpop.eup %2902 }
 0xe92   :  { %v1205_v49 = vmul.f32 %v2404_v46, %v1197_v47  ;;  %v1198_v50 = vmul.f32 %v2903_v48, %v1182_v30 }
 0xe94   :  { %v1206_v52 = vmul.f32 %v2404_v46, %v1198_v50  ;;  %v3297_v55 = vadd.f32 %v2405_v51, %v1205_v49 }
 0xe96   :  { %v3299_v57 = vadd.f32 %v2405_v51, %v1206_v52 }
 0xe98   :  { %v3306_v59 = vpack.c.bf16 %v3299_v57, %v3297_v55 }
 0xe9a   :  { %2715 = vmatmul.mubr.msk.bf16.vlgmr.msra.gmra.mrb[28].mxu0 %vm145_vm4, %v3306_v59  ;;  %2731 = vmatmul.mubr.msk.bf16.vlgmr.msra.gmra.mrb[32].mxu1 %vm145_vm4, %v3306_v59 }
 0xe9b   :  { %2719 = vmatpush3.bf16.msra.mxu0 %v2854_v58  ;;  %2722 = vmatprep.mubr.msk.bf16.mxu0 %vm2934_vm0, %v2933_v2 }
 0xe9c   :  { %2720 = vmatprep.subr.bf16.mxu0 %v2933_v2  ;;  %2742 = vmatprep.mubr.msk.bf16.mxu1 %vm2934_vm0, %v2933_v2 }
 0xe9f   :  { %2721 = vmatpush3.bf16.msra.mxu0 %v2855_v60 }
 0xea0   :  { %2734 = vmatprep.subr.bf16.mxu0 %v2933_v2 }
 0xea2   :  { %2723 = vmatmul.mubr.msk.bf16.vlgmr.msra.gmra.mrb[32].mxu0 %vm145_vm4, %v3306_v59 }
 0xea3   :  { %2736 = vmatprep.mubr.msk.bf16.mxu0 %vm2934_vm0, %v2933_v2 }
 0xf6d   :  { %v1278_v62 = vpop.f32.mrb[28].mxu0  ;;  %v1410_v0 = vpop.f32.mrb[32].mxu1 }
 0xf6e   :  { %v2716_v1 = vpop.f32.mrb[29].mxu0  ;;  %v2732_v3 = vpop.f32.mrb[33].mxu1  ;;  %v1279_v6 = vadd.f32 %v2411_v61, %v1278_v62  ;;  %v1411_v7 = vadd.f32 %v2429_v63, %v1410_v0 }
 0xf6f   :  { %v1281_v4 = vpop.f32.mrb[30].mxu0  ;;  %v1413_v5 = vpop.f32.mrb[34].mxu1 }
 0xf70   :  { %v1282_v8 = vadd.f32 %v2411_v61, %v1281_v4  ;;  %v1414_v9 = vadd.f32 %v2429_v63, %v1413_v5  ;;  %v2717_v10 = vpop.f32.mrb[31].mxu0  ;;  %v2733_v11 = vpop.f32.mrb[35].mxu1 }
 0xf71   :  { %v2860_v11 = vld [vmem:[%s3507_s5 + $0x90] sm:$0xff]  }
 0xf72   :  { %v1417_v12 = vpack.c.bf16 %v1282_v8, %v1279_v6  ;;  %v1493_v13 = vpack.c.bf16 %v1414_v9, %v1411_v7 }
 0xf74   :  { %2741 = vmatpush3.bf16.msra.mxu1 %v1493_v13  ;;  %v2861_v13 = vld [vmem:[%s3507_s5 + $0x98] sm:$0xff]  }
 0xf75   :  { %v1344_v15 = vpop.f32.mrb[32].mxu0  ;;  %2754 = vmatprep.subr.bf16.mxu1 %v2933_v2 }
 0xf76   :  { %v2724_v16 = vpop.f32.mrb[33].mxu0  ;;  %v1345_v18 = vadd.f32 %v2420_v14, %v1344_v15 }
 0xf77   :  { %v1347_v17 = vpop.f32.mrb[34].mxu0 }
 0xf78   :  { %v1348_v19 = vadd.f32 %v2420_v14, %v1347_v17  ;;  %v2725_v20 = vpop.f32.mrb[35].mxu0 }
 0xf7a   :  { %v1418_v21 = vpack.c.bf16 %v1348_v19, %v1345_v18  ;;  %v2451_v19 = vld [vmem:[%s3509_s6 + $0x9] ss:$0 sm:$0xff] }
 0xf7c   :  { %v1423_v56 = vsel %vm393_vm5, %v1418_v21, 0 }
 0xf7d   :  { %2735 = vmatpush3.bf16.xpose.msra.mxu0 %v1423_v56 }
 0xf7e   :  { %2746 = vmatprep.subr.bf16.mxu0 %v2933_v2 }
 0xf84   :  { %2737 = vmatmul.mubr.msk.bf16.vlgmr.msra.gmra.mrb[36].mxu0 %vm393_vm5, %v1417_v12 }
 0xf85   :  { %2747 = vmatpush3.bf16.msra.mxu0 %v2856_v22  ;;  %2750 = vmatprep.mubr.msk.bf16.mxu0 %vm2934_vm0, %v2933_v2 }
 0xf86   :  { %2748 = vmatprep.subr.bf16.mxu0 %v2933_v2 }
 0xf89   :  { %2749 = vmatpush3.bf16.msra.mxu0 %v2857_v23 }
 0xf8a   :  { %2762 = vmatprep.subr.bf16.mxu0 %v2933_v2 }
 0xf8c   :  { %2751 = vmatmul.mubr.msk.bf16.vlgmr.msra.gmra.mrb[40].mxu0 %vm145_vm4, %v3306_v59 }
 0xf8d   :  { %2763 = vmatpush3.bf16.msra.mxu0 %v2858_v24  ;;  %2766 = vmatprep.mubr.msk.bf16.mxu0 %vm2934_vm0, %v2933_v2 }
 0xf8e   :  { %2764 = vmatprep.subr.bf16.mxu0 %v2933_v2 }
 0xf91   :  { %2765 = vmatpush3.bf16.msra.mxu0 %v2859_v53 }
 0xf92   :  { %2776 = vmatprep.subr.bf16.mxu0 %v2933_v2 }
 0xf94   :  { %2767 = vmatmul.mubr.msk.bf16.vlgmr.msra.gmra.mrb[44].mxu0 %vm145_vm4, %v3306_v59 }
 0xf95   :  { %2778 = vmatprep.mubr.msk.bf16.mxu0 %vm2934_vm0, %v2933_v2 }
0x1057   :  { %v1459_v54 = vpop.f32.mrb[36].mxu0 }
0x1058   :  { %v1466_v26 = vmul.f32 0.25, %v1459_v54  ;;  %v2738_v27 = vpop.f32.mrb[37].mxu0 }
0x1059   :  { %v1462_v28 = vpop.f32.mrb[38].mxu0 }
0x105a   :  { %v1467_v30 = vmul.f32 0.25, %v1462_v28  ;;  %v2739_v31 = vpop.f32.mrb[39].mxu0  ;;  %v1468_v32 = vadd.f32 %v1466_v26, %v3145_v25 }
0x105c   :  { %v1470_v33 = vsel %vm393_vm5, %v1468_v32, -inf  ;;  %v1469_v34 = vadd.f32 %v1467_v30, %v3150_v29 }
0x105d   :  { %1471 = vmax.xlane.f32.xlu1 %v1470_v33 }
0x105e   :  { %v1473_v35 = vsel %vm393_vm5, %v1469_v34, -inf }
0x105f   :  { %1474 = vmax.xlane.f32.xlu0 %v1473_v35  ;;  %v1601_v37 = vpop.f32.mrb[40].mxu0 }
0x1060   :  { %v2752_v38 = vpop.f32.mrb[41].mxu0  ;;  %v3371_v40 = vadd.f32 %v2442_v36, %v1601_v37 }
0x1061   :  { %v1604_v39 = vpop.f32.mrb[42].mxu0 }
0x1062   :  { %v3373_v41 = vadd.f32 %v2442_v36, %v1604_v39  ;;  %v2753_v42 = vpop.f32.mrb[43].mxu0 }
0x1064   :  { %v1740_v43 = vpack.c.bf16 %v3373_v41, %v3371_v40 }
0x1067   :  { %v1733_v45 = vpop.f32.mrb[44].mxu0 }
0x1068   :  { %v2768_v46 = vpop.f32.mrb[45].mxu0  ;;  %v1734_v48 = vadd.f32 %v2460_v44, %v1733_v45 }
0x1069   :  { %v1736_v47 = vpop.f32.mrb[46].mxu0 }
0x106a   :  { %v1737_v49 = vadd.f32 %v2460_v44, %v1736_v47  ;;  %v2769_v50 = vpop.f32.mrb[47].mxu0 }
0x106c   :  { %v1816_v51 = vpack.c.bf16 %v1737_v49, %v1734_v48 }
0x106e   :  { %2777 = vmatpush3.bf16.msra.mxu0 %v1816_v51  ;;  %v2862_v51 = vld [vmem:[%s3511_s7 + $0x10] sm:$0xff]  }
0x106f   :  { %2788 = vmatprep.subr.bf16.mxu0 %v2933_v2 }
0x10ea   :  { %v1472_v52 = vpop.xlane.xlu1 %1471 }
0x10eb   :  { %v1476_v58 = vsub.f32 %v1468_v32, %v1472_v52 }
0x10ec   :  { %v1475_v60 = vpop.xlane.xlu0 %1474 }
0x10ed   :  { %v1478_v61 = vmul.f32 1.442695, %v1476_v58  ;;  %v1477_v62 = vsub.f32 %v1469_v34, %v1475_v60 }
0x10ef   :  { %2904 = vpow2.f32 %v1478_v61  ;;  %v1480_v63 = vmul.f32 1.442695, %v1477_v62 }
0x10f1   :  { %2906 = vpow2.f32 %v1480_v63 }
0x10f9   :  { %v2905_v0 = vpop.eup %2904 }
0x10fa   :  { %v1482_v1 = vsel %vm393_vm5, %v2905_v0, 0.0 }
0x10fb   :  { %v2907_v3 = vpop.eup %2906  ;;  %1483 = vadd.xlane.f32.xlu1 %v1482_v1 }
0x10fc   :  { %v1485_v4 = vsel %vm393_vm5, %v2907_v3, 0.0 }
0x10fd   :  { %1486 = vadd.xlane.f32.xlu0 %v1485_v4 }
0x1188   :  { %v1484_v5 = vpop.xlane.xlu1 %1483 }
0x1189   :  { %2908 = vrcp.f32 %v1484_v5 }
0x118a   :  { %v1487_v6 = vpop.xlane.xlu0 %1486 }
0x118b   :  { %2910 = vrcp.f32 %v1487_v6  ;;  %v2473_v6 = vld [vmem:[%s3512_s8 + $0x6] ss:$0 sm:$0xff] }
0x1193   :  { %v2909_v7 = vpop.eup %2908 }
0x1194   :  { %v1490_v9 = vmul.f32 %v2909_v7, %v2905_v0 }
0x1195   :  { %v2911_v8 = vpop.eup %2910 }
0x1196   :  { %v1491_v10 = vmul.f32 %v2911_v8, %v2907_v3 }
0x1198   :  { %v1492_v12 = vpack.c.bf16 %v1491_v10, %v1490_v9 }
0x119a   :  { %2743 = vmatmul.mubr.msk.bf16.vlgmr.msra.gmra.mrb[36].mxu1 %vm393_vm5, %v1492_v12 }
0x119b   :  { %2755 = vmatpush3.bf16.msra.mxu1 %v2860_v11  ;;  %2758 = vmatprep.mubr.msk.bf16.mxu1 %vm2934_vm0, %v2933_v2 }
0x119c   :  { %2756 = vmatprep.subr.bf16.mxu1 %v2933_v2 }
0x119f   :  { %2757 = vmatpush3.bf16.msra.mxu1 %v2861_v13 }
0x11a0   :  { %2770 = vmatprep.subr.bf16.mxu1 %v2933_v2 }
0x11a2   :  { %2759 = vmatmul.mubr.msk.bf16.vlgmr.msra.gmra.mrb[40].mxu1 %vm145_vm4, %v3306_v59 }
0x11a3   :  { %2772 = vmatprep.mubr.msk.bf16.mxu1 %vm2934_vm0, %v2933_v2 }
0x126d   :  { %v1531_v14 = vpop.f32.mrb[36].mxu1 }
0x126e   :  { %v2744_v15 = vpop.f32.mrb[37].mxu1 }
0x126f   :  { %v1534_v16 = vpop.f32.mrb[38].mxu1 }
0x1270   :  { %v1538_v17 = vpack.c.bf16 %v1534_v16, %v1531_v14  ;;  %v2745_v18 = vpop.f32.mrb[39].mxu1 }
0x1275   :  { %v1667_v20 = vpop.f32.mrb[40].mxu1 }
0x1276   :  { %v2760_v21 = vpop.f32.mrb[41].mxu1  ;;  %v1668_v22 = vadd.f32 %v2451_v19, %v1667_v20 }
0x1277   :  { %v1670_v56 = vpop.f32.mrb[42].mxu1 }
0x1278   :  { %v1671_v23 = vadd.f32 %v2451_v19, %v1670_v56  ;;  %v2761_v24 = vpop.f32.mrb[43].mxu1 }
0x127a   :  { %v1741_v53 = vpack.c.bf16 %v1671_v23, %v1668_v22 }
0x127c   :  { %v1746_v59 = vsel %vm393_vm5, %v1741_v53, 0 }
0x127d   :  { %2771 = vmatpush3.bf16.xpose.msra.mxu1 %v1746_v59  ;;  %v2865_v59 = vld [vmem:[%s3513_s10 + $0x18] sm:$0xff]  }
0x127e   :  { %2782 = vmatprep.subr.bf16.mxu1 %v2933_v2 }
0x1284   :  { %2773 = vmatmul.mubr.msk.bf16.vlgmr.msra.gmra.mrb[44].mxu1 %vm393_vm5, %v1740_v43 }
0x1285   :  { %2784 = vmatprep.mubr.msk.bf16.mxu1 %vm2934_vm0, %v2933_v2 }
0x1357   :  { %v1782_v54 = vpop.f32.mrb[44].mxu1 }
0x1358   :  { %v1789_v26 = vmul.f32 0.25, %v1782_v54  ;;  %v2774_v27 = vpop.f32.mrb[45].mxu1 }
0x1359   :  { %v1785_v28 = vpop.f32.mrb[46].mxu1 }
0x135a   :  { %v1790_v30 = vmul.f32 0.25, %v1785_v28  ;;  %v2775_v31 = vpop.f32.mrb[47].mxu1  ;;  %v1791_v32 = vadd.f32 %v1789_v26, %v3145_v25 }
0x135c   :  { %v1793_v33 = vsel %vm393_vm5, %v1791_v32, -inf  ;;  %v1792_v34 = vadd.f32 %v1790_v30, %v3150_v29  ;;  %v2863_v29 = vld [vmem:[%s3511_s7 + $0x18] sm:$0xff]  }
0x135d   :  { %1794 = vmax.xlane.f32.xlu1 %v1793_v33  ;;  %2783 = vmatpush3.bf16.msra.mxu1 %v2863_v29  ;;  %v2476_v33 = vld [vmem:[%s3512_s8 + $0x7] ss:$0 sm:$0xff]  ;;  %v2869_v29 = vld [vmem:[%s3514_s11 + $0x38] sm:$0xff]  }
0x135e   :  { %v1796_v35 = vsel %vm393_vm5, %v1792_v34, -inf  ;;  %2794 = vmatprep.subr.bf16.mxu1 %v2933_v2 }
0x135f   :  { %1797 = vmax.xlane.f32.xlu0 %v1796_v35 }
0x13ea   :  { %v1795_v36 = vpop.xlane.xlu1 %1794 }
0x13eb   :  { %v1799_v37 = vsub.f32 %v1791_v32, %v1795_v36 }
0x13ec   :  { %v1798_v38 = vpop.xlane.xlu0 %1797 }
0x13ed   :  { %v1801_v39 = vmul.f32 1.442695, %v1799_v37  ;;  %v1800_v40 = vsub.f32 %v1792_v34, %v1798_v38  ;;  %v2477_v38 = vld [vmem:[%s3512_s8 + $0x8] ss:$0 sm:$0xff] }
0x13ef   :  { %2912 = vpow2.f32 %v1801_v39  ;;  %v1803_v41 = vmul.f32 1.442695, %v1800_v40 }
0x13f1   :  { %2914 = vpow2.f32 %v1803_v41 }
0x13f9   :  { %v2913_v42 = vpop.eup %2912 }
0x13fa   :  { %v1805_v43 = vsel %vm393_vm5, %v2913_v42, 0.0 }
0x13fb   :  { %v2915_v25 = vpop.eup %2914  ;;  %1806 = vadd.xlane.f32.xlu1 %v1805_v43  ;;  %v2866_v43 = vld [vmem:[%s3514_s11 + $0x20] sm:$0xff]  }
0x13fc   :  { %v1808_v44 = vsel %vm393_vm5, %v2915_v25, 0.0 }
0x13fd   :  { %1809 = vadd.xlane.f32.xlu0 %v1808_v44  ;;  %v2868_v44 = vld [vmem:[%s3514_s11 + $0x30] sm:$0xff]  }
0x1488   :  { %v1807_v45 = vpop.xlane.xlu1 %1806 }
0x1489   :  { %2916 = vrcp.f32 %v1807_v45  ;;  %v2483_v45 = vld [vmem:[%s3515_s9 + $0x1] ss:$0 sm:$0xff] }
0x148a   :  { %v1810_v46 = vpop.xlane.xlu0 %1809 }
0x148b   :  { %2918 = vrcp.f32 %v1810_v46 }
0x1493   :  { %v2917_v47 = vpop.eup %2916 }
0x1494   :  { %v1813_v49 = vmul.f32 %v2917_v47, %v2913_v42 }
0x1495   :  { %v2919_v48 = vpop.eup %2918 }
0x1496   :  { %v1814_v50 = vmul.f32 %v2919_v48, %v2915_v25  ;;  %v2867_v25 = vld [vmem:[%s3514_s11 + $0x28] sm:$0xff]  }
0x1498   :  { %v1815_v52 = vpack.c.bf16 %v1814_v50, %v1813_v49 }
0x149a   :  { %2779 = vmatmul.mubr.msk.bf16.vlgmr.msra.gmra.mrb[48].mxu0 %vm393_vm5, %v1815_v52 }
0x149b   :  { %2789 = vmatpush3.bf16.msra.mxu0 %v2862_v51  ;;  %2790 = vmatprep.mubr.msk.bf16.mxu0 %vm2934_vm0, %v2933_v2 }
0x149c   :  { %2802 = vmatprep.subr.bf16.mxu0 %v2933_v2 }
0x14a2   :  { %2791 = vmatmul.mubr.msk.bf16.vlgmr.msra.gmra.mrb[52].mxu0 %vm393_vm5, %v1538_v17 }
0x14a3   :  { %2810 = vmatprep.mubr.msk.bf16.mxu0 %vm2934_vm0, %v2933_v2  ;;  %2803 = vmatpush3.bf16.msra.mxu0 %v2866_v43 }
0x14a4   :  { %2804 = vmatprep.subr.bf16.mxu0 %v2933_v2 }
0x14a7   :  { %2805 = vmatpush3.bf16.msra.mxu0 %v2867_v25  ;;  %v2505_v25 = vld [vmem:[%s3512_s8 + $0xb] ss:$0 sm:$0xff] }
0x14a8   :  { %2806 = vmatprep.subr.bf16.mxu0 %v2933_v2 }
0x14ab   :  { %2807 = vmatpush3.bf16.msra.mxu0 %v2868_v44 }
0x14ac   :  { %2808 = vmatprep.subr.bf16.mxu0 %v2933_v2 }
0x14af   :  { %2809 = vmatpush3.bf16.msra.mxu0 %v2869_v29 }
0x156d   :  { %v1854_v58 = vpop.f32.mrb[48].mxu0 }
0x156e   :  { %v2780_v60 = vpop.f32.mrb[49].mxu0 }
0x156f   :  { %v1857_v61 = vpop.f32.mrb[50].mxu0 }
0x1570   :  { %v1861_v62 = vpack.c.bf16 %v1857_v61, %v1854_v58  ;;  %v2781_v63 = vpop.f32.mrb[51].mxu0 }
0x1572   :  { %2785 = vmatmul.mubr.msk.bf16.vlgmr.msra.gmra.mrb[48].mxu1 %vm393_vm5, %v1861_v62 }
0x1573   :  { %2798 = vmatprep.mubr.msk.bf16.mxu1 %vm2934_vm0, %v2933_v2 }
0x1575   :  { %v1958_v0 = vpop.f32.mrb[52].mxu0 }
0x1576   :  { %v2792_v1 = vpop.f32.mrb[53].mxu0 }
0x1577   :  { %v1961_v3 = vpop.f32.mrb[54].mxu0 }
0x1578   :  { %v2793_v4 = vpop.f32.mrb[55].mxu0 }
0x1645   :  { %v1908_v5 = vpop.f32.mrb[48].mxu1 }
0x1646   :  { %v1959_v7 = vadd.f32 %v1958_v0, %v1908_v5  ;;  %v2786_v8 = vpop.f32.mrb[49].mxu1 }
0x1647   :  { %v1911_v9 = vpop.f32.mrb[50].mxu1 }
0x1648   :  { %v1973_v10 = vadd.f32 %v2473_v6, %v1959_v7  ;;  %v1962_v11 = vadd.f32 %v1961_v3, %v1911_v9  ;;  %v2787_v12 = vpop.f32.mrb[51].mxu1 }
0x164a   :  { %v1974_v13 = vadd.f32 %v2473_v6, %v1962_v11  ;;  %v1975_v14 = vadd.f32 %v1973_v10, %v3297_v55 }
0x164c   :  { %v1981_v15 = vsel %vm145_vm4, %v1975_v14, 0.0  ;;  %v1976_v16 = vadd.f32 %v1974_v13, %v3299_v57  ;;  %v2864_v57 = vld [vmem:[%s3513_s10 + $0x10] sm:$0xff]  }
0x164d   :  { %1982 = vadd.xlane.f32.xlu1 %v1981_v15  ;;  %2795 = vmatpush3.bf16.msra.mxu1 %v2864_v57 }
0x164e   :  { %v1984_v17 = vsel %vm145_vm4, %v1976_v16, 0.0  ;;  %2796 = vmatprep.subr.bf16.mxu1 %v2933_v2 }
0x164f   :  { %1985 = vadd.xlane.f32.xlu0 %v1984_v17 }
0x1651   :  { %2797 = vmatpush3.bf16.msra.mxu1 %v2865_v59 }
0x1652   :  { %2814 = vmatprep.subr.bf16.mxu1 %v2933_v2 }
0x16da   :  { %v1983_v18 = vpop.xlane.xlu1 %1982 }
0x16db   :  { %v1987_v19 = vmul.f32 0.03125, %v1983_v18 }
0x16dc   :  { %v1986_v20 = vpop.xlane.xlu0 %1985 }
0x16dd   :  { %v1989_v21 = vsub.f32 %v1975_v14, %v1987_v19  ;;  %v1988_v56 = vmul.f32 0.03125, %v1986_v20  ;;  %v2496_v14 = vld [vmem:[%s3512_s8 + $0x9] ss:$0 sm:$0xff] }
0x16df   :  { %v1990_v22 = vsub.f32 %v1976_v16, %v1988_v56  ;;  %v1991_v23 = vmul.f32 %v1989_v21, %v1989_v21 }
0x16e1   :  { %v1993_v24 = vsel %vm145_vm4, %v1991_v23, 0.0  ;;  %v1992_v53 = vmul.f32 %v1990_v22, %v1990_v22 }
0x16e2   :  { %1994 = vadd.xlane.f32.xlu1 %v1993_v24 }
0x16e3   :  { %v1996_v55 = vsel %vm145_vm4, %v1992_v53, 0.0 }
0x16e4   :  { %1997 = vadd.xlane.f32.xlu0 %v1996_v55 }
0x176f   :  { %v1995_v54 = vpop.xlane.xlu1 %1994 }
0x1770   :  { %v1999_v26 = vmul.f32 0.03125, %v1995_v54 }
0x1771   :  { %v1998_v27 = vpop.xlane.xlu0 %1997 }
0x1772   :  { %v2001_v28 = vadd.f32 1e-12, %v1999_v26  ;;  %v2000_v30 = vmul.f32 0.03125, %v1998_v27 }
0x1774   :  { %2920 = vrsqrt.f32 %v2001_v28  ;;  %v2002_v31 = vadd.f32 1e-12, %v2000_v30 }
0x1776   :  { %2922 = vrsqrt.f32 %v2002_v31  ;;  %v2870_v31 = vld [vmem:[%s3516_s12] sm:$0xff]  }
0x177e   :  { %v2921_v32 = vpop.eup %2920 }
0x177f   :  { %v2005_v34 = vmul.f32 %v2921_v32, %v1989_v21  ;;  %v2871_v32 = vld [vmem:[%s3516_s12 + $0x8] sm:$0xff]  }
0x1780   :  { %v2923_v35 = vpop.eup %2922 }
0x1781   :  { %v2013_v36 = vmul.f32 %v2476_v33, %v2005_v34  ;;  %v2006_v37 = vmul.f32 %v2923_v35, %v1990_v22 }
0x1783   :  { %v2014_v39 = vmul.f32 %v2476_v33, %v2006_v37  ;;  %v2021_v40 = vadd.f32 %v2477_v38, %v2013_v36 }
0x1785   :  { %v2022_v41 = vadd.f32 %v2477_v38, %v2014_v39 }
0x1787   :  { %v2023_v42 = vpack.c.bf16 %v2022_v41, %v2021_v40 }
0x1789   :  { %2799 = vmatmul.mubr.msk.bf16.vlgmr.msra.gmra.mrb[52].mxu1 %vm145_vm4, %v2023_v42 }
0x178a   :  { %2818 = vmatprep.mubr.msk.bf16.mxu1 %vm2934_vm0, %v2933_v2  ;;  %2815 = vmatpush3.bf16.msra.mxu1 %v2870_v31 }
0x178b   :  { %2816 = vmatprep.subr.bf16.mxu1 %v2933_v2 }
0x178e   :  { %2817 = vmatpush3.bf16.msra.mxu1 %v2871_v32 }
0x185c   :  { %v2086_v46 = vpop.f32.mrb[52].mxu1 }
0x185d   :  { %v2087_v47 = vadd.f32 %v2483_v45, %v2086_v46  ;;  %v2800_v48 = vpop.f32.mrb[53].mxu1 }
0x185e   :  { %v2089_v49 = vpop.f32.mrb[54].mxu1 }
0x185f   :  { %v2095_v50 = vmul.f32 0.044715, %v2087_v47  ;;  %v2090_v51 = vadd.f32 %v2483_v45, %v2089_v49  ;;  %v2801_v52 = vpop.f32.mrb[55].mxu1  ;;  %v2093_v8 = vmul.f32 0.5, %v2087_v47 }
0x1861   :  { %v2097_v58 = vmul.f32 %v2095_v50, %v2087_v47  ;;  %v2096_v60 = vmul.f32 0.044715, %v2090_v51  ;;  %v2094_v9 = vmul.f32 0.5, %v2090_v51 }
0x1863   :  { %v2099_v61 = vmul.f32 %v2097_v58, %v2087_v47  ;;  %v2098_v62 = vmul.f32 %v2096_v60, %v2090_v51 }
0x1865   :  { %v2101_v63 = vadd.f32 %v2099_v61, %v2087_v47  ;;  %v2100_v0 = vmul.f32 %v2098_v62, %v2090_v51  ;;  %v2506_v47 = vld [vmem:[%s3517_s13] ss:$0 sm:$0xff] }
0x1867   :  { %v2103_v1 = vmul.f32 0.7978846, %v2101_v63  ;;  %v2102_v3 = vadd.f32 %v2100_v0, %v2090_v51 }
0x1869   :  { %2924 = vtanh.f32 %v2103_v1  ;;  %v2104_v4 = vmul.f32 0.7978846, %v2102_v3 }
0x186b   :  { %2926 = vtanh.f32 %v2104_v4 }
0x1873   :  { %v2925_v5 = vpop.eup %2924 }
0x1874   :  { %v2107_v6 = vadd.f32 1.0, %v2925_v5 }
0x1875   :  { %v2927_v7 = vpop.eup %2926 }
0x1876   :  { %v2108_v10 = vadd.f32 1.0, %v2927_v7  ;;  %v2109_v11 = vmul.f32 %v2107_v6, %v2093_v8 }
0x1878   :  { %v2110_v12 = vmul.f32 %v2108_v10, %v2094_v9 }
0x187a   :  { %v2111_v13 = vpack.c.bf16 %v2110_v12, %v2109_v11 }
0x187c   :  { %2811 = vmatmul.mubr.msk.bf16.vlgmr.msra.gmra.mrb[56].mxu0 %vm97_vm3, %v2111_v13 }
0x194f   :  { %v2190_v15 = vpop.f32.mrb[56].mxu0 }
0x1950   :  { %v2191_v16 = vadd.f32 %v2496_v14, %v2190_v15  ;;  %v2812_v17 = vpop.f32.mrb[57].mxu0 }
0x1951   :  { %v2193_v18 = vpop.f32.mrb[58].mxu0 }
0x1952   :  { %v2194_v19 = vadd.f32 %v2496_v14, %v2193_v18  ;;  %v2813_v20 = vpop.f32.mrb[59].mxu0  ;;  %v2197_v21 = vadd.f32 %v2191_v16, %v2021_v40  ;;  %v2504_v40 = vld [vmem:[%s3512_s8 + $0xa] ss:$0 sm:$0xff] }
0x1954   :  { %v2203_v56 = vsel %vm145_vm4, %v2197_v21, 0.0  ;;  %v2198_v22 = vadd.f32 %v2194_v19, %v2022_v41 }
0x1955   :  { %2204 = vadd.xlane.f32.xlu1 %v2203_v56 }
0x1956   :  { %v2206_v23 = vsel %vm145_vm4, %v2198_v22, 0.0 }
0x1957   :  { %2207 = vadd.xlane.f32.xlu0 %v2206_v23 }
0x19e2   :  { %v2205_v24 = vpop.xlane.xlu1 %2204 }
0x19e3   :  { %v2209_v53 = vmul.f32 0.03125, %v2205_v24 }
0x19e4   :  { %v2208_v55 = vpop.xlane.xlu0 %2207 }
0x19e5   :  { %v2211_v57 = vsub.f32 %v2197_v21, %v2209_v53  ;;  %v2210_v59 = vmul.f32 0.03125, %v2208_v55 }
0x19e7   :  { %v2212_v54 = vsub.f32 %v2198_v22, %v2210_v59  ;;  %v2213_v26 = vmul.f32 %v2211_v57, %v2211_v57 }
0x19e9   :  { %v2215_v27 = vsel %vm145_vm4, %v2213_v26, 0.0  ;;  %v2214_v28 = vmul.f32 %v2212_v54, %v2212_v54 }
0x19ea   :  { %2216 = vadd.xlane.f32.xlu1 %v2215_v27 }
0x19eb   :  { %v2218_v30 = vsel %vm145_vm4, %v2214_v28, 0.0 }
0x19ec   :  { %2219 = vadd.xlane.f32.xlu0 %v2218_v30 }
0x1a77   :  { %v2217_v33 = vpop.xlane.xlu1 %2216 }
0x1a78   :  { %v2221_v34 = vmul.f32 0.03125, %v2217_v33 }
0x1a79   :  { %v2220_v35 = vpop.xlane.xlu0 %2219 }
0x1a7a   :  { %v2223_v36 = vadd.f32 1e-12, %v2221_v34  ;;  %v2222_v37 = vmul.f32 0.03125, %v2220_v35 }
0x1a7c   :  { %2928 = vrsqrt.f32 %v2223_v36  ;;  %v2224_v38 = vadd.f32 1e-12, %v2222_v37 }
0x1a7e   :  { %2930 = vrsqrt.f32 %v2224_v38 }
0x1a86   :  { %v2929_v39 = vpop.eup %2928 }
0x1a87   :  { %v2227_v41 = vmul.f32 %v2929_v39, %v2211_v57 }
0x1a88   :  { %v2931_v2 = vpop.eup %2930 }
0x1a89   :  { %v2235_v42 = vmul.f32 %v2504_v40, %v2227_v41  ;;  %v2228_v43 = vmul.f32 %v2931_v2, %v2212_v54 }
0x1a8b   :  { %v2236_v44 = vmul.f32 %v2504_v40, %v2228_v43  ;;  %v2243_v29 = vadd.f32 %v2505_v25, %v2235_v42 }
0x1a8d   :  { %v2244_v45 = vadd.f32 %v2505_v25, %v2236_v44 }
0x1a8f   :  { %v2245_v46 = vpack.c.bf16 %v2244_v45, %v2243_v29 }
0x1a91   :  { %2819 = vmatmul.mubr.msk.bf16.vlgmr.msra.gmra.mrb[56].mxu1 %vm145_vm4, %v2245_v46 }
0x1b64   :  { %v2306_v48 = vpop.f32.mrb[56].mxu1 }
0x1b65   :  { %v2307_v49 = vadd.f32 %v2506_v47, %v2306_v48  ;;  %v2820_v50 = vpop.f32.mrb[57].mxu1 }
0x1b66   :  { %v2309_v51 = vpop.f32.mrb[58].mxu1 }
0x1b67   :  { %2313 = vst [vmem:[%s3518_s14] sm:$0xff] %v2307_v49  ;;  %v2310_v52 = vadd.f32 %v2506_v47, %v2309_v51  ;;  %v2821_v58 = vpop.f32.mrb[59].mxu1 }
0x1b69   :  { %2314 = vst [vmem:[%s3518_s14 + $0x8] sm:$0xff] %v2310_v52 }

</bundles_post_ra>
